<compile_context>
chip_gen: v5e
topology: v5e:2x2
jax: 0.10.0
libtpu: 0.0.40
codegen_flags: <defaults>
</compile_context>

<pallas_src>
import functools

import jax
import jax.numpy as jnp
import numpy as np
from jax.experimental import pallas as pl
from jax.experimental.pallas import tpu as pltpu

LN_EPS = 1e-5


# ----------------------------- rotary cache (glue, plain JAX) -----------------------------
def _rotary_cos_sin(seq_len, dim, base=10000.0):
    inv_freq = 1.0 / (base ** (jnp.arange(0, dim, 2, dtype=jnp.float32) / dim))
    t = jnp.arange(seq_len, dtype=jnp.float32)
    freqs = jnp.outer(t, inv_freq)
    emb = jnp.concatenate([freqs, freqs], axis=-1)  # [seq_len, dim]
    return jnp.cos(emb), jnp.sin(emb)


def _pick_block_bt(bt, cap=8):
    """Largest divisor of bt that is <= cap (keeps blocks VMEM-friendly on v7x)."""
    cap = max(1, min(cap, bt))
    for c in range(cap, 0, -1):
        if bt % c == 0:
            return c
    return 1


# ----------------------------------- fused Pallas kernel ----------------------------------
def _fused_kernel(x_ref, cos_i_ref, sin_i_ref, cos_t_ref, sin_t_ref,
                  sslots_ref, tslots_ref, ln_w_ref, ln_b_ref, w_out_ref,
                  o_ref, *, image_dim):
    tb, n, d = x_ref.shape
    half = d // 2
    l_time = n - image_dim

    # Constants: the index_map returns the same block every step, so Pallas keeps them
    # resident in VMEM (no re-DMA).  Hoist the loads out of the per-element loop.
    cos_i = cos_i_ref[...]
    sin_i = sin_i_ref[...]          # sign-folded: carries the rotate_half minus sign
    cos_t = cos_t_ref[...]
    sin_t = sin_t_ref[...]
    sslots = sslots_ref[...]        # [S, d]
    tslots = tslots_ref[...]        # [T, d]
    ln_w = ln_w_ref[...]            # [1, d]
    ln_b = ln_b_ref[...]
    w_out = w_out_ref[...]          # [d, H]

    def one(j, carry):
        # Static (aligned) token-range slices of this (b*t) element's tile.
        xi = x_ref[j, pl.ds(0, image_dim), :].astype(jnp.float32)      # [L_img, d]
        xt = x_ref[j, pl.ds(image_dim, l_time), :].astype(jnp.float32)  # [L_time, d]

        # --- image path: LayerNorm -> RoPE -> slot attention -> readout ---
        mean = jnp.mean(xi, axis=-1, keepdims=True)
        var = jnp.mean(jnp.square(xi - mean), axis=-1, keepdims=True)
        xi = (xi - mean) * jax.lax.rsqrt(var + LN_EPS)
        xi = xi * ln_w + ln_b

        # RoPE: rotate_half(x) == roll(x, d//2) * [-1]*half + [+1]*half; the sign is
        # baked into sin_* on the host, so this is one XLU roll + two VPU multiplies.
        xi = xi * cos_i + pltpu.roll(xi, shift=half, axis=1) * sin_i
        xt = xt * cos_t + pltpu.roll(xt, shift=half, axis=1) * sin_t

        # Transposed [S, L] layout: contraction over d (A @ B^T), softmax along lanes.
        li = jax.lax.dot_general(sslots, xi, (((1,), (1,)), ((), ())),
                                 preferred_element_type=jnp.float32)   # [S, L_img]
        li = li - jnp.max(li, axis=-1, keepdims=True)
        ei = jnp.exp(li)
        ai = ei / jnp.sum(ei, axis=-1, keepdims=True)                  # softmax over tokens
        pooled_i = jnp.dot(ai, xi, preferred_element_type=jnp.float32)  # [S, d]
        out_i = jnp.dot(pooled_i, w_out, preferred_element_type=jnp.float32)  # [S, H]

        # --- time path: RoPE -> slot attention (no LN, no readout, as in torch) ---
        lt = jax.lax.dot_general(tslots, xt, (((1,), (1,)), ((), ())),
                                 preferred_element_type=jnp.float32)   # [T, L_time]
        lt = lt - jnp.max(lt, axis=-1, keepdims=True)
        et = jnp.exp(lt)
        at = et / jnp.sum(et, axis=-1, keepdims=True)
        pooled_t = jnp.dot(at, xt, preferred_element_type=jnp.float32)  # [T, d]

        # Fused, lane-dense output write: [S+T, H] (H == d).
        o_ref[j] = jnp.concatenate([out_i, pooled_t], axis=0).astype(o_ref.dtype)
        return carry

    jax.lax.fori_loop(0, tb, one, 0, unroll=True)


# ----------------------------------- wrapper ----------------------------------------------
@functools.partial(jax.jit, static_argnames=("image_dim", "block_bt_cap"))
def spatial_time_slot_pool(x, params, image_dim, block_bt_cap=8):
    if x.ndim == 5:                                   # [b, t, h, w, d] -> [b, t, h*w, d]
        b, t, h, w, d = x.shape
        x = x.reshape(b, t, h * w, d)
    b, t, n, d = x.shape
    bt = b * t
    l_img = image_dim
    l_time = n - image_dim
    assert 0 < image_dim < n, "need both image and time tokens"
    assert d % 2 == 0, "rotary dim must be even"

    S = params["spatial_slots"].shape[1]
    T = params["time_slots"].shape[1]
    H = params["readout_w"].shape[0]
    # The torch concat mixes readout'd image slots ([..., hidden]) with raw time slots
    # ([..., mm_hidden]); it is only well defined when hidden == mm_hidden.
    assert H == d, "hidden_size must equal mm_hidden_size for the slot concat"

    xf = x.reshape(bt, n, d)

    # Rotary tables; fold the rotate_half sign into sin (first half negative).
    cos_i, sin_i = _rotary_cos_sin(l_img, d)
    cos_t, sin_t = _rotary_cos_sin(l_time, d)
    sign = jnp.concatenate([-jnp.ones((d // 2,), jnp.float32),
                            jnp.ones((d // 2,), jnp.float32)])
    sin_i = sin_i * sign
    sin_t = sin_t * sign

    sslots_t = params["spatial_slots"].T              # [S, d]
    tslots_t = params["time_slots"].T                 # [T, d]
    w_out_t = params["readout_w"].T                   # [d, H]
    ln_w = params["ln_w"].reshape(1, d)
    ln_b = params["ln_b"].reshape(1, d)

    tb = _pick_block_bt(bt, cap=block_bt_cap)
    bytes_per = jnp.dtype(x.dtype).itemsize
    # Double-buffered x block + double-buffered out block + resident constants (+ slack).
    vmem_need = (2 * tb * n * d * bytes_per
                 + 2 * tb * (S + T) * H * bytes_per
                 + (2 * (l_img + l_time) * d + (S + T) * d + 2 * d + d * H) * 4)
    vmem_limit = int(min(max(4 * vmem_need, 16 * 1024 * 1024), 48 * 1024 * 1024))

    out = pl.pallas_call(
        functools.partial(_fused_kernel, image_dim=image_dim),
        out_shape=jax.ShapeDtypeStruct((bt, S + T, H), x.dtype),
        grid_spec=pltpu.PrefetchScalarGridSpec(
            num_scalar_prefetch=0,
            grid=(bt // tb,),
            in_specs=[
                pl.BlockSpec((tb, n, d), lambda i: (i, 0, 0)),      # x (read once)
                pl.BlockSpec((l_img, d), lambda i: (0, 0)),         # cos (image)
                pl.BlockSpec((l_img, d), lambda i: (0, 0)),         # signed sin (image)
                pl.BlockSpec((l_time, d), lambda i: (0, 0)),        # cos (time)
                pl.BlockSpec((l_time, d), lambda i: (0, 0)),        # signed sin (time)
                pl.BlockSpec((S, d), lambda i: (0, 0)),             # spatial slots^T
                pl.BlockSpec((T, d), lambda i: (0, 0)),             # time slots^T
                pl.BlockSpec((1, d), lambda i: (0, 0)),             # ln weight
                pl.BlockSpec((1, d), lambda i: (0, 0)),             # ln bias
                pl.BlockSpec((d, H), lambda i: (0, 0)),             # readout W^T
            ],
            out_specs=pl.BlockSpec((tb, S + T, H), lambda i: (i, 0, 0)),
        ),
        compiler_params=pltpu.CompilerParams(
            dimension_semantics=("parallel",),       # shards bt across v7x TensorCores
            vmem_limit_bytes=vmem_limit,
        ),
    )(xf, cos_i, sin_i, cos_t, sin_t, sslots_t, tslots_t, ln_w, ln_b, w_out_t)

    return out.reshape(b, t, S + T, H)


# ----------------------------------- pure-JAX reference -----------------------------------
def _rotate_half(x):
    d = x.shape[-1]
    return jnp.concatenate([-x[..., d // 2:], x[..., : d // 2]], axis=-1)


def reference(x, params, image_dim):
    b, t, n, d = x.shape
    xf = x.reshape(b * t, n, d)
    ix = xf[:, :image_dim]
    tx = xf[:, image_dim:]

    mean = ix.mean(-1, keepdims=True)
    var = ((ix - mean) ** 2).mean(-1, keepdims=True)
    ix = (ix - mean) / jnp.sqrt(var + LN_EPS) * params["ln_w"] + params["ln_b"]
    cos, sin = _rotary_cos_sin(image_dim, d)
    ix = ix * cos + _rotate_half(ix) * sin
    attn = jax.nn.softmax(ix @ params["spatial_slots"], axis=1)
    pooled = jnp.einsum("bls,bld->bsd", attn, ix)
    img = pooled @ params["readout_w"].T

    cos2, sin2 = _rotary_cos_sin(n - image_dim, d)
    tx = tx * cos2 + _rotate_half(tx) * sin2
    tattn = jax.nn.softmax(tx @ params["time_slots"], axis=1)
    tpool = jnp.einsum("bls,bld->bsd", tattn, tx)

    S = params["spatial_slots"].shape[1]
    T = params["time_slots"].shape[1]
    H = params["readout_w"].shape[0]
    img = img.reshape(b, t, S, H)
    tpool = tpool.reshape(b, t, T, d)
    return jnp.concatenate([img, tpool], axis=2)


# --------------------------------------- main ----------------------------------------------
if __name__ == "__main__":
    key = jax.random.PRNGKey(0)
    b, t = 2, 2
    mm_hidden = 128         # config.mm_hidden_size (d); 128 keeps the RoPE lane roll and
    hidden = 128            # the output store a full, unmasked 128-lane vreg
    image_dim = 64          # small analogue of the default 576
    time_len = 8
    n = image_dim + time_len
    S, T = 8, 1             # num_spatial_slots, num_time_slots

    k1, k2, k3, k4 = jax.random.split(key, 4)
    x = jax.random.normal(k1, (b, t, n, mm_hidden), dtype=jnp.float32)
    params = {
        "spatial_slots": jax.random.normal(k2, (mm_hidden, S), dtype=jnp.float32),
        "time_slots": jax.random.normal(k3, (mm_hidden, T), dtype=jnp.float32),
        "readout_w": jax.random.normal(k4, (hidden, mm_hidden), dtype=jnp.float32) * 0.05,
        "ln_w": jnp.ones((mm_hidden,), jnp.float32),
        "ln_b": jnp.zeros((mm_hidden,), jnp.float32),
    }

    out = spatial_time_slot_pool(x, params, image_dim)
    out = jax.block_until_ready(out)
    assert out.shape == (b, t, S + T, hidden), out.shape

    ref = reference(x, params, image_dim)
    np.testing.assert_allclose(np.asarray(out), np.asarray(ref), rtol=5e-4, atol=5e-4)
    print("KERNEL_OK")
</pallas_src>

<mosaic_0001>
module attributes {stable_mosaic.version = 11 : i64} {
  func.func @_fused_kernel(%arg0: i32, %arg1: memref<4x72x128xf32, #tpu.memory_space<vmem>>, %arg2: memref<64x128xf32, #tpu.memory_space<vmem>>, %arg3: memref<64x128xf32, #tpu.memory_space<vmem>>, %arg4: memref<8x128xf32, #tpu.memory_space<vmem>>, %arg5: memref<8x128xf32, #tpu.memory_space<vmem>>, %arg6: memref<8x128xf32, #tpu.memory_space<vmem>>, %arg7: memref<1x128xf32, #tpu.memory_space<vmem>>, %arg8: memref<1x128xf32, #tpu.memory_space<vmem>>, %arg9: memref<1x128xf32, #tpu.memory_space<vmem>>, %arg10: memref<128x128xf32, #tpu.memory_space<vmem>>, %arg11: memref<4x9x128xf32, #tpu.memory_space<vmem>>) attributes {dimension_semantics = [#tpu.dimension_semantics<parallel>], iteration_bounds = array<i64: 1>, scalar_prefetch = 0 : i64, scratch_operands = 0 : i64, tpu.core_type = #tpu.core_type<tc>, window_params = [{transform_indices = @transform_0, window_bounds = array<i64: 4, 72, 128>}, {pipeline_mode = #tpu.pipeline_mode<synchronous>, transform_indices = @transform_1, window_bounds = array<i64: 64, 128>}, {pipeline_mode = #tpu.pipeline_mode<synchronous>, transform_indices = @transform_2, window_bounds = array<i64: 64, 128>}, {pipeline_mode = #tpu.pipeline_mode<synchronous>, transform_indices = @transform_3, window_bounds = array<i64: 8, 128>}, {pipeline_mode = #tpu.pipeline_mode<synchronous>, transform_indices = @transform_4, window_bounds = array<i64: 8, 128>}, {pipeline_mode = #tpu.pipeline_mode<synchronous>, transform_indices = @transform_5, window_bounds = array<i64: 8, 128>}, {pipeline_mode = #tpu.pipeline_mode<synchronous>, transform_indices = @transform_6, window_bounds = array<i64: 1, 128>}, {pipeline_mode = #tpu.pipeline_mode<synchronous>, transform_indices = @transform_7, window_bounds = array<i64: 1, 128>}, {pipeline_mode = #tpu.pipeline_mode<synchronous>, transform_indices = @transform_8, window_bounds = array<i64: 1, 128>}, {pipeline_mode = #tpu.pipeline_mode<synchronous>, transform_indices = @transform_9, window_bounds = array<i64: 128, 128>}, {transform_indices = @transform_10, window_bounds = array<i64: 4, 9, 128>}]} {
    %c0 = arith.constant 0 : index
    %c0_0 = arith.constant 0 : index
    %0 = vector.load %arg2[%c0, %c0_0] : memref<64x128xf32, #tpu.memory_space<vmem>>, vector<64x128xf32>
    %c0_1 = arith.constant 0 : index
    %c0_2 = arith.constant 0 : index
    %1 = vector.load %arg3[%c0_1, %c0_2] : memref<64x128xf32, #tpu.memory_space<vmem>>, vector<64x128xf32>
    %c0_3 = arith.constant 0 : index
    %c0_4 = arith.constant 0 : index
    %2 = vector.load %arg4[%c0_3, %c0_4] : memref<8x128xf32, #tpu.memory_space<vmem>>, vector<8x128xf32>
    %c0_5 = arith.constant 0 : index
    %c0_6 = arith.constant 0 : index
    %3 = vector.load %arg5[%c0_5, %c0_6] : memref<8x128xf32, #tpu.memory_space<vmem>>, vector<8x128xf32>
    %c0_7 = arith.constant 0 : index
    %c0_8 = arith.constant 0 : index
    %4 = vector.load %arg6[%c0_7, %c0_8] : memref<8x128xf32, #tpu.memory_space<vmem>>, vector<8x128xf32>
    %c0_9 = arith.constant 0 : index
    %c0_10 = arith.constant 0 : index
    %5 = vector.load %arg7[%c0_9, %c0_10] : memref<1x128xf32, #tpu.memory_space<vmem>>, vector<1x128xf32>
    %c0_11 = arith.constant 0 : index
    %c0_12 = arith.constant 0 : index
    %6 = vector.load %arg8[%c0_11, %c0_12] : memref<1x128xf32, #tpu.memory_space<vmem>>, vector<1x128xf32>
    %c0_13 = arith.constant 0 : index
    %c0_14 = arith.constant 0 : index
    %7 = vector.load %arg9[%c0_13, %c0_14] : memref<1x128xf32, #tpu.memory_space<vmem>>, vector<1x128xf32>
    %c0_15 = arith.constant 0 : index
    %c0_16 = arith.constant 0 : index
    %8 = vector.load %arg10[%c0_15, %c0_16] : memref<128x128xf32, #tpu.memory_space<vmem>>, vector<128x128xf32>
    %c0_i32 = arith.constant 0 : i32
    %9 = arith.index_cast %c0_i32 : i32 to index
    %c0_17 = arith.constant 0 : index
    %c0_18 = arith.constant 0 : index
    %10 = vector.load %arg1[%9, %c0_17, %c0_18] : memref<4x72x128xf32, #tpu.memory_space<vmem>>, vector<1x64x128xf32>
    %11 = vector.shape_cast %10 : vector<1x64x128xf32> to vector<64x128xf32>
    %12 = arith.index_cast %c0_i32 : i32 to index
    %c64 = arith.constant 64 : index
    %c0_19 = arith.constant 0 : index
    %13 = vector.load %arg1[%12, %c64, %c0_19] : memref<4x72x128xf32, #tpu.memory_space<vmem>>, vector<1x8x128xf32>
    %14 = vector.shape_cast %13 : vector<1x8x128xf32> to vector<8x128xf32>
    %cst = arith.constant dense<0.000000e+00> : vector<64xf32>
    %15 = vector.multi_reduction <add>, %11, %cst [1] : vector<64x128xf32> to vector<64xf32>
    %16 = vector.shape_cast %15 : vector<64xf32> to vector<64x1xf32>
    %cst_20 = arith.constant 1.280000e+02 : f32
    %17 = vector.broadcast %cst_20 : f32 to vector<64x1xf32>
    %18 = arith.divf %16, %17 : vector<64x1xf32>
    %19 = vector.broadcast %18 : vector<64x1xf32> to vector<64x128xf32>
    %20 = arith.subf %11, %19 : vector<64x128xf32>
    %21 = arith.mulf %20, %20 : vector<64x128xf32>
    %cst_21 = arith.constant dense<0.000000e+00> : vector<64xf32>
    %22 = vector.multi_reduction <add>, %21, %cst_21 [1] : vector<64x128xf32> to vector<64xf32>
    %23 = vector.shape_cast %22 : vector<64xf32> to vector<64x1xf32>
    %cst_22 = arith.constant 1.280000e+02 : f32
    %24 = vector.broadcast %cst_22 : f32 to vector<64x1xf32>
    %25 = arith.divf %23, %24 : vector<64x1xf32>
    %26 = vector.broadcast %18 : vector<64x1xf32> to vector<64x128xf32>
    %27 = arith.subf %11, %26 : vector<64x128xf32>
    %cst_23 = arith.constant 9.99999974E-6 : f32
    %28 = vector.broadcast %cst_23 : f32 to vector<64x1xf32>
    %29 = arith.addf %25, %28 : vector<64x1xf32>
    %30 = math.rsqrt %29 : vector<64x1xf32>
    %31 = vector.broadcast %30 : vector<64x1xf32> to vector<64x128xf32>
    %32 = arith.mulf %27, %31 : vector<64x128xf32>
    %33 = vector.broadcast %6 : vector<1x128xf32> to vector<64x128xf32>
    %34 = arith.mulf %32, %33 : vector<64x128xf32>
    %35 = vector.broadcast %7 : vector<1x128xf32> to vector<64x128xf32>
    %36 = arith.addf %34, %35 : vector<64x128xf32>
    %37 = arith.mulf %36, %0 : vector<64x128xf32>
    %c64_i32 = arith.constant 64 : i32
    %38 = tpu.dynamic_rotate %36 by %c64_i32 dim 1 : vector<64x128xf32>, i32 -> vector<64x128xf32>
    %39 = arith.mulf %38, %1 : vector<64x128xf32>
    %40 = arith.addf %37, %39 : vector<64x128xf32>
    %41 = arith.mulf %14, %2 : vector<8x128xf32>
    %c64_i32_24 = arith.constant 64 : i32
    %42 = tpu.dynamic_rotate %14 by %c64_i32_24 dim 1 : vector<8x128xf32>, i32 -> vector<8x128xf32>
    %43 = arith.mulf %42, %3 : vector<8x128xf32>
    %44 = arith.addf %41, %43 : vector<8x128xf32>
    %cst_25 = arith.constant dense<0.000000e+00> : vector<8x64xf32>
    %45 = tpu.matmul %4, %40, %cst_25 {dimension_numbers = #tpu.dot_dimension_numbers<[1], [1], [0], [0], [0, 0, 1, 0], [], []>} : vector<8x128xf32>, vector<64x128xf32>, vector<8x64xf32> -> vector<8x64xf32>
    %cst_26 = arith.constant dense<0xFF800000> : vector<8xf32>
    %46 = vector.multi_reduction <maximumf>, %45, %cst_26 [1] : vector<8x64xf32> to vector<8xf32>
    %47 = vector.shape_cast %46 : vector<8xf32> to vector<8x1xf32>
    %48 = vector.broadcast %47 : vector<8x1xf32> to vector<8x64xf32>
    %49 = arith.subf %45, %48 : vector<8x64xf32>
    %50 = math.exp %49 : vector<8x64xf32>
    %cst_27 = arith.constant dense<0.000000e+00> : vector<8xf32>
    %51 = vector.multi_reduction <add>, %50, %cst_27 [1] : vector<8x64xf32> to vector<8xf32>
    %52 = vector.shape_cast %51 : vector<8xf32> to vector<8x1xf32>
    %53 = vector.broadcast %52 : vector<8x1xf32> to vector<8x64xf32>
    %54 = arith.divf %50, %53 : vector<8x64xf32>
    %cst_28 = arith.constant dense<0.000000e+00> : vector<8x128xf32>
    %55 = tpu.matmul %54, %40, %cst_28 {dimension_numbers = #tpu.dot_dimension_numbers<[1], [0], [0], [1], [0, 0, 1, 1], [], []>} : vector<8x64xf32>, vector<64x128xf32>, vector<8x128xf32> -> vector<8x128xf32>
    %cst_29 = arith.constant dense<0.000000e+00> : vector<8x128xf32>
    %56 = tpu.matmul %55, %8, %cst_29 {dimension_numbers = #tpu.dot_dimension_numbers<[1], [0], [0], [1], [0, 0, 1, 1], [], []>} : vector<8x128xf32>, vector<128x128xf32>, vector<8x128xf32> -> vector<8x128xf32>
    %cst_30 = arith.constant dense<0.000000e+00> : vector<1x8xf32>
    %57 = tpu.matmul %5, %44, %cst_30 {dimension_numbers = #tpu.dot_dimension_numbers<[1], [1], [0], [0], [0, 0, 1, 0], [], []>} : vector<1x128xf32>, vector<8x128xf32>, vector<1x8xf32> -> vector<1x8xf32>
    %cst_31 = arith.constant dense<0xFF800000> : vector<1xf32>
    %58 = vector.multi_reduction <maximumf>, %57, %cst_31 [1] : vector<1x8xf32> to vector<1xf32>
    %59 = vector.shape_cast %58 : vector<1xf32> to vector<1x1xf32>
    %60 = vector.broadcast %59 : vector<1x1xf32> to vector<1x8xf32>
    %61 = arith.subf %57, %60 : vector<1x8xf32>
    %62 = math.exp %61 : vector<1x8xf32>
    %cst_32 = arith.constant dense<0.000000e+00> : vector<1xf32>
    %63 = vector.multi_reduction <add>, %62, %cst_32 [1] : vector<1x8xf32> to vector<1xf32>
    %64 = vector.shape_cast %63 : vector<1xf32> to vector<1x1xf32>
    %65 = vector.broadcast %64 : vector<1x1xf32> to vector<1x8xf32>
    %66 = arith.divf %62, %65 : vector<1x8xf32>
    %cst_33 = arith.constant dense<0.000000e+00> : vector<1x128xf32>
    %67 = tpu.matmul %66, %44, %cst_33 {dimension_numbers = #tpu.dot_dimension_numbers<[1], [0], [0], [1], [0, 0, 1, 1], [], []>} : vector<1x8xf32>, vector<8x128xf32>, vector<1x128xf32> -> vector<1x128xf32>
    %68 = tpu.concatenate %56, %67 in 0 : vector<8x128xf32>, vector<1x128xf32> -> vector<9x128xf32>
    %69 = arith.index_cast %c0_i32 : i32 to index
    %c0_34 = arith.constant 0 : index
    %c0_35 = arith.constant 0 : index
    %70 = vector.load %arg11[%69, %c0_34, %c0_35] : memref<4x9x128xf32, #tpu.memory_space<vmem>>, vector<1x9x128xf32>
    %71 = vector.shape_cast %70 : vector<1x9x128xf32> to vector<9x128xf32>
    %72 = vector.shape_cast %68 : vector<9x128xf32> to vector<1x9x128xf32>
    tpu.vector_store %arg11[%69, %c0_34, %c0_35], %72 {strides = array<i32>} : memref<4x9x128xf32, #tpu.memory_space<vmem>>, vector<1x9x128xf32>,
    %c1_i32 = arith.constant 1 : i32
    %73 = arith.index_cast %c1_i32 : i32 to index
    %c0_36 = arith.constant 0 : index
    %c0_37 = arith.constant 0 : index
    %74 = vector.load %arg1[%73, %c0_36, %c0_37] : memref<4x72x128xf32, #tpu.memory_space<vmem>>, vector<1x64x128xf32>
    %75 = vector.shape_cast %74 : vector<1x64x128xf32> to vector<64x128xf32>
    %76 = arith.index_cast %c1_i32 : i32 to index
    %c64_38 = arith.constant 64 : index
    %c0_39 = arith.constant 0 : index
    %77 = vector.load %arg1[%76, %c64_38, %c0_39] : memref<4x72x128xf32, #tpu.memory_space<vmem>>, vector<1x8x128xf32>
    %78 = vector.shape_cast %77 : vector<1x8x128xf32> to vector<8x128xf32>
    %cst_40 = arith.constant dense<0.000000e+00> : vector<64xf32>
    %79 = vector.multi_reduction <add>, %75, %cst_40 [1] : vector<64x128xf32> to vector<64xf32>
    %80 = vector.shape_cast %79 : vector<64xf32> to vector<64x1xf32>
    %cst_41 = arith.constant 1.280000e+02 : f32
    %81 = vector.broadcast %cst_41 : f32 to vector<64x1xf32>
    %82 = arith.divf %80, %81 : vector<64x1xf32>
    %83 = vector.broadcast %82 : vector<64x1xf32> to vector<64x128xf32>
    %84 = arith.subf %75, %83 : vector<64x128xf32>
    %85 = arith.mulf %84, %84 : vector<64x128xf32>
    %cst_42 = arith.constant dense<0.000000e+00> : vector<64xf32>
    %86 = vector.multi_reduction <add>, %85, %cst_42 [1] : vector<64x128xf32> to vector<64xf32>
    %87 = vector.shape_cast %86 : vector<64xf32> to vector<64x1xf32>
    %cst_43 = arith.constant 1.280000e+02 : f32
    %88 = vector.broadcast %cst_43 : f32 to vector<64x1xf32>
    %89 = arith.divf %87, %88 : vector<64x1xf32>
    %90 = vector.broadcast %82 : vector<64x1xf32> to vector<64x128xf32>
    %91 = arith.subf %75, %90 : vector<64x128xf32>
    %cst_44 = arith.constant 9.99999974E-6 : f32
    %92 = vector.broadcast %cst_44 : f32 to vector<64x1xf32>
    %93 = arith.addf %89, %92 : vector<64x1xf32>
    %94 = math.rsqrt %93 : vector<64x1xf32>
    %95 = vector.broadcast %94 : vector<64x1xf32> to vector<64x128xf32>
    %96 = arith.mulf %91, %95 : vector<64x128xf32>
    %97 = vector.broadcast %6 : vector<1x128xf32> to vector<64x128xf32>
    %98 = arith.mulf %96, %97 : vector<64x128xf32>
    %99 = vector.broadcast %7 : vector<1x128xf32> to vector<64x128xf32>
    %100 = arith.addf %98, %99 : vector<64x128xf32>
    %101 = arith.mulf %100, %0 : vector<64x128xf32>
    %c64_i32_45 = arith.constant 64 : i32
    %102 = tpu.dynamic_rotate %100 by %c64_i32_45 dim 1 : vector<64x128xf32>, i32 -> vector<64x128xf32>
    %103 = arith.mulf %102, %1 : vector<64x128xf32>
    %104 = arith.addf %101, %103 : vector<64x128xf32>
    %105 = arith.mulf %78, %2 : vector<8x128xf32>
    %c64_i32_46 = arith.constant 64 : i32
    %106 = tpu.dynamic_rotate %78 by %c64_i32_46 dim 1 : vector<8x128xf32>, i32 -> vector<8x128xf32>
    %107 = arith.mulf %106, %3 : vector<8x128xf32>
    %108 = arith.addf %105, %107 : vector<8x128xf32>
    %cst_47 = arith.constant dense<0.000000e+00> : vector<8x64xf32>
    %109 = tpu.matmul %4, %104, %cst_47 {dimension_numbers = #tpu.dot_dimension_numbers<[1], [1], [0], [0], [0, 0, 1, 0], [], []>} : vector<8x128xf32>, vector<64x128xf32>, vector<8x64xf32> -> vector<8x64xf32>
    %cst_48 = arith.constant dense<0xFF800000> : vector<8xf32>
    %110 = vector.multi_reduction <maximumf>, %109, %cst_48 [1] : vector<8x64xf32> to vector<8xf32>
    %111 = vector.shape_cast %110 : vector<8xf32> to vector<8x1xf32>
    %112 = vector.broadcast %111 : vector<8x1xf32> to vector<8x64xf32>
    %113 = arith.subf %109, %112 : vector<8x64xf32>
    %114 = math.exp %113 : vector<8x64xf32>
    %cst_49 = arith.constant dense<0.000000e+00> : vector<8xf32>
    %115 = vector.multi_reduction <add>, %114, %cst_49 [1] : vector<8x64xf32> to vector<8xf32>
    %116 = vector.shape_cast %115 : vector<8xf32> to vector<8x1xf32>
    %117 = vector.broadcast %116 : vector<8x1xf32> to vector<8x64xf32>
    %118 = arith.divf %114, %117 : vector<8x64xf32>
    %cst_50 = arith.constant dense<0.000000e+00> : vector<8x128xf32>
    %119 = tpu.matmul %118, %104, %cst_50 {dimension_numbers = #tpu.dot_dimension_numbers<[1], [0], [0], [1], [0, 0, 1, 1], [], []>} : vector<8x64xf32>, vector<64x128xf32>, vector<8x128xf32> -> vector<8x128xf32>
    %cst_51 = arith.constant dense<0.000000e+00> : vector<8x128xf32>
    %120 = tpu.matmul %119, %8, %cst_51 {dimension_numbers = #tpu.dot_dimension_numbers<[1], [0], [0], [1], [0, 0, 1, 1], [], []>} : vector<8x128xf32>, vector<128x128xf32>, vector<8x128xf32> -> vector<8x128xf32>
    %cst_52 = arith.constant dense<0.000000e+00> : vector<1x8xf32>
    %121 = tpu.matmul %5, %108, %cst_52 {dimension_numbers = #tpu.dot_dimension_numbers<[1], [1], [0], [0], [0, 0, 1, 0], [], []>} : vector<1x128xf32>, vector<8x128xf32>, vector<1x8xf32> -> vector<1x8xf32>
    %cst_53 = arith.constant dense<0xFF800000> : vector<1xf32>
    %122 = vector.multi_reduction <maximumf>, %121, %cst_53 [1] : vector<1x8xf32> to vector<1xf32>
    %123 = vector.shape_cast %122 : vector<1xf32> to vector<1x1xf32>
    %124 = vector.broadcast %123 : vector<1x1xf32> to vector<1x8xf32>
    %125 = arith.subf %121, %124 : vector<1x8xf32>
    %126 = math.exp %125 : vector<1x8xf32>
    %cst_54 = arith.constant dense<0.000000e+00> : vector<1xf32>
    %127 = vector.multi_reduction <add>, %126, %cst_54 [1] : vector<1x8xf32> to vector<1xf32>
    %128 = vector.shape_cast %127 : vector<1xf32> to vector<1x1xf32>
    %129 = vector.broadcast %128 : vector<1x1xf32> to vector<1x8xf32>
    %130 = arith.divf %126, %129 : vector<1x8xf32>
    %cst_55 = arith.constant dense<0.000000e+00> : vector<1x128xf32>
    %131 = tpu.matmul %130, %108, %cst_55 {dimension_numbers = #tpu.dot_dimension_numbers<[1], [0], [0], [1], [0, 0, 1, 1], [], []>} : vector<1x8xf32>, vector<8x128xf32>, vector<1x128xf32> -> vector<1x128xf32>
    %132 = tpu.concatenate %120, %131 in 0 : vector<8x128xf32>, vector<1x128xf32> -> vector<9x128xf32>
    %133 = arith.index_cast %c1_i32 : i32 to index
    %c0_56 = arith.constant 0 : index
    %c0_57 = arith.constant 0 : index
    %134 = vector.load %arg11[%133, %c0_56, %c0_57] : memref<4x9x128xf32, #tpu.memory_space<vmem>>, vector<1x9x128xf32>
    %135 = vector.shape_cast %134 : vector<1x9x128xf32> to vector<9x128xf32>
    %136 = vector.shape_cast %132 : vector<9x128xf32> to vector<1x9x128xf32>
    tpu.vector_store %arg11[%133, %c0_56, %c0_57], %136 {strides = array<i32>} : memref<4x9x128xf32, #tpu.memory_space<vmem>>, vector<1x9x128xf32>,
    %c2_i32 = arith.constant 2 : i32
    %137 = arith.index_cast %c2_i32 : i32 to index
    %c0_58 = arith.constant 0 : index
    %c0_59 = arith.constant 0 : index
    %138 = vector.load %arg1[%137, %c0_58, %c0_59] : memref<4x72x128xf32, #tpu.memory_space<vmem>>, vector<1x64x128xf32>
    %139 = vector.shape_cast %138 : vector<1x64x128xf32> to vector<64x128xf32>
    %140 = arith.index_cast %c2_i32 : i32 to index
    %c64_60 = arith.constant 64 : index
    %c0_61 = arith.constant 0 : index
    %141 = vector.load %arg1[%140, %c64_60, %c0_61] : memref<4x72x128xf32, #tpu.memory_space<vmem>>, vector<1x8x128xf32>
    %142 = vector.shape_cast %141 : vector<1x8x128xf32> to vector<8x128xf32>
    %cst_62 = arith.constant dense<0.000000e+00> : vector<64xf32>
    %143 = vector.multi_reduction <add>, %139, %cst_62 [1] : vector<64x128xf32> to vector<64xf32>
    %144 = vector.shape_cast %143 : vector<64xf32> to vector<64x1xf32>
    %cst_63 = arith.constant 1.280000e+02 : f32
    %145 = vector.broadcast %cst_63 : f32 to vector<64x1xf32>
    %146 = arith.divf %144, %145 : vector<64x1xf32>
    %147 = vector.broadcast %146 : vector<64x1xf32> to vector<64x128xf32>
    %148 = arith.subf %139, %147 : vector<64x128xf32>
    %149 = arith.mulf %148, %148 : vector<64x128xf32>
    %cst_64 = arith.constant dense<0.000000e+00> : vector<64xf32>
    %150 = vector.multi_reduction <add>, %149, %cst_64 [1] : vector<64x128xf32> to vector<64xf32>
    %151 = vector.shape_cast %150 : vector<64xf32> to vector<64x1xf32>
    %cst_65 = arith.constant 1.280000e+02 : f32
    %152 = vector.broadcast %cst_65 : f32 to vector<64x1xf32>
    %153 = arith.divf %151, %152 : vector<64x1xf32>
    %154 = vector.broadcast %146 : vector<64x1xf32> to vector<64x128xf32>
    %155 = arith.subf %139, %154 : vector<64x128xf32>
    %cst_66 = arith.constant 9.99999974E-6 : f32
    %156 = vector.broadcast %cst_66 : f32 to vector<64x1xf32>
    %157 = arith.addf %153, %156 : vector<64x1xf32>
    %158 = math.rsqrt %157 : vector<64x1xf32>
    %159 = vector.broadcast %158 : vector<64x1xf32> to vector<64x128xf32>
    %160 = arith.mulf %155, %159 : vector<64x128xf32>
    %161 = vector.broadcast %6 : vector<1x128xf32> to vector<64x128xf32>
    %162 = arith.mulf %160, %161 : vector<64x128xf32>
    %163 = vector.broadcast %7 : vector<1x128xf32> to vector<64x128xf32>
    %164 = arith.addf %162, %163 : vector<64x128xf32>
    %165 = arith.mulf %164, %0 : vector<64x128xf32>
    %c64_i32_67 = arith.constant 64 : i32
    %166 = tpu.dynamic_rotate %164 by %c64_i32_67 dim 1 : vector<64x128xf32>, i32 -> vector<64x128xf32>
    %167 = arith.mulf %166, %1 : vector<64x128xf32>
    %168 = arith.addf %165, %167 : vector<64x128xf32>
    %169 = arith.mulf %142, %2 : vector<8x128xf32>
    %c64_i32_68 = arith.constant 64 : i32
    %170 = tpu.dynamic_rotate %142 by %c64_i32_68 dim 1 : vector<8x128xf32>, i32 -> vector<8x128xf32>
    %171 = arith.mulf %170, %3 : vector<8x128xf32>
    %172 = arith.addf %169, %171 : vector<8x128xf32>
    %cst_69 = arith.constant dense<0.000000e+00> : vector<8x64xf32>
    %173 = tpu.matmul %4, %168, %cst_69 {dimension_numbers = #tpu.dot_dimension_numbers<[1], [1], [0], [0], [0, 0, 1, 0], [], []>} : vector<8x128xf32>, vector<64x128xf32>, vector<8x64xf32> -> vector<8x64xf32>
    %cst_70 = arith.constant dense<0xFF800000> : vector<8xf32>
    %174 = vector.multi_reduction <maximumf>, %173, %cst_70 [1] : vector<8x64xf32> to vector<8xf32>
    %175 = vector.shape_cast %174 : vector<8xf32> to vector<8x1xf32>
    %176 = vector.broadcast %175 : vector<8x1xf32> to vector<8x64xf32>
    %177 = arith.subf %173, %176 : vector<8x64xf32>
    %178 = math.exp %177 : vector<8x64xf32>
    %cst_71 = arith.constant dense<0.000000e+00> : vector<8xf32>
    %179 = vector.multi_reduction <add>, %178, %cst_71 [1] : vector<8x64xf32> to vector<8xf32>
    %180 = vector.shape_cast %179 : vector<8xf32> to vector<8x1xf32>
    %181 = vector.broadcast %180 : vector<8x1xf32> to vector<8x64xf32>
    %182 = arith.divf %178, %181 : vector<8x64xf32>
    %cst_72 = arith.constant dense<0.000000e+00> : vector<8x128xf32>
    %183 = tpu.matmul %182, %168, %cst_72 {dimension_numbers = #tpu.dot_dimension_numbers<[1], [0], [0], [1], [0, 0, 1, 1], [], []>} : vector<8x64xf32>, vector<64x128xf32>, vector<8x128xf32> -> vector<8x128xf32>
    %cst_73 = arith.constant dense<0.000000e+00> : vector<8x128xf32>
    %184 = tpu.matmul %183, %8, %cst_73 {dimension_numbers = #tpu.dot_dimension_numbers<[1], [0], [0], [1], [0, 0, 1, 1], [], []>} : vector<8x128xf32>, vector<128x128xf32>, vector<8x128xf32> -> vector<8x128xf32>
    %cst_74 = arith.constant dense<0.000000e+00> : vector<1x8xf32>
    %185 = tpu.matmul %5, %172, %cst_74 {dimension_numbers = #tpu.dot_dimension_numbers<[1], [1], [0], [0], [0, 0, 1, 0], [], []>} : vector<1x128xf32>, vector<8x128xf32>, vector<1x8xf32> -> vector<1x8xf32>
    %cst_75 = arith.constant dense<0xFF800000> : vector<1xf32>
    %186 = vector.multi_reduction <maximumf>, %185, %cst_75 [1] : vector<1x8xf32> to vector<1xf32>
    %187 = vector.shape_cast %186 : vector<1xf32> to vector<1x1xf32>
    %188 = vector.broadcast %187 : vector<1x1xf32> to vector<1x8xf32>
    %189 = arith.subf %185, %188 : vector<1x8xf32>
    %190 = math.exp %189 : vector<1x8xf32>
    %cst_76 = arith.constant dense<0.000000e+00> : vector<1xf32>
    %191 = vector.multi_reduction <add>, %190, %cst_76 [1] : vector<1x8xf32> to vector<1xf32>
    %192 = vector.shape_cast %191 : vector<1xf32> to vector<1x1xf32>
    %193 = vector.broadcast %192 : vector<1x1xf32> to vector<1x8xf32>
    %194 = arith.divf %190, %193 : vector<1x8xf32>
    %cst_77 = arith.constant dense<0.000000e+00> : vector<1x128xf32>
    %195 = tpu.matmul %194, %172, %cst_77 {dimension_numbers = #tpu.dot_dimension_numbers<[1], [0], [0], [1], [0, 0, 1, 1], [], []>} : vector<1x8xf32>, vector<8x128xf32>, vector<1x128xf32> -> vector<1x128xf32>
    %196 = tpu.concatenate %184, %195 in 0 : vector<8x128xf32>, vector<1x128xf32> -> vector<9x128xf32>
    %197 = arith.index_cast %c2_i32 : i32 to index
    %c0_78 = arith.constant 0 : index
    %c0_79 = arith.constant 0 : index
    %198 = vector.load %arg11[%197, %c0_78, %c0_79] : memref<4x9x128xf32, #tpu.memory_space<vmem>>, vector<1x9x128xf32>
    %199 = vector.shape_cast %198 : vector<1x9x128xf32> to vector<9x128xf32>
    %200 = vector.shape_cast %196 : vector<9x128xf32> to vector<1x9x128xf32>
    tpu.vector_store %arg11[%197, %c0_78, %c0_79], %200 {strides = array<i32>} : memref<4x9x128xf32, #tpu.memory_space<vmem>>, vector<1x9x128xf32>,
    %c3_i32 = arith.constant 3 : i32
    %201 = arith.index_cast %c3_i32 : i32 to index
    %c0_80 = arith.constant 0 : index
    %c0_81 = arith.constant 0 : index
    %202 = vector.load %arg1[%201, %c0_80, %c0_81] : memref<4x72x128xf32, #tpu.memory_space<vmem>>, vector<1x64x128xf32>
    %203 = vector.shape_cast %202 : vector<1x64x128xf32> to vector<64x128xf32>
    %204 = arith.index_cast %c3_i32 : i32 to index
    %c64_82 = arith.constant 64 : index
    %c0_83 = arith.constant 0 : index
    %205 = vector.load %arg1[%204, %c64_82, %c0_83] : memref<4x72x128xf32, #tpu.memory_space<vmem>>, vector<1x8x128xf32>
    %206 = vector.shape_cast %205 : vector<1x8x128xf32> to vector<8x128xf32>
    %cst_84 = arith.constant dense<0.000000e+00> : vector<64xf32>
    %207 = vector.multi_reduction <add>, %203, %cst_84 [1] : vector<64x128xf32> to vector<64xf32>
    %208 = vector.shape_cast %207 : vector<64xf32> to vector<64x1xf32>
    %cst_85 = arith.constant 1.280000e+02 : f32
    %209 = vector.broadcast %cst_85 : f32 to vector<64x1xf32>
    %210 = arith.divf %208, %209 : vector<64x1xf32>
    %211 = vector.broadcast %210 : vector<64x1xf32> to vector<64x128xf32>
    %212 = arith.subf %203, %211 : vector<64x128xf32>
    %213 = arith.mulf %212, %212 : vector<64x128xf32>
    %cst_86 = arith.constant dense<0.000000e+00> : vector<64xf32>
    %214 = vector.multi_reduction <add>, %213, %cst_86 [1] : vector<64x128xf32> to vector<64xf32>
    %215 = vector.shape_cast %214 : vector<64xf32> to vector<64x1xf32>
    %cst_87 = arith.constant 1.280000e+02 : f32
    %216 = vector.broadcast %cst_87 : f32 to vector<64x1xf32>
    %217 = arith.divf %215, %216 : vector<64x1xf32>
    %218 = vector.broadcast %210 : vector<64x1xf32> to vector<64x128xf32>
    %219 = arith.subf %203, %218 : vector<64x128xf32>
    %cst_88 = arith.constant 9.99999974E-6 : f32
    %220 = vector.broadcast %cst_88 : f32 to vector<64x1xf32>
    %221 = arith.addf %217, %220 : vector<64x1xf32>
    %222 = math.rsqrt %221 : vector<64x1xf32>
    %223 = vector.broadcast %222 : vector<64x1xf32> to vector<64x128xf32>
    %224 = arith.mulf %219, %223 : vector<64x128xf32>
    %225 = vector.broadcast %6 : vector<1x128xf32> to vector<64x128xf32>
    %226 = arith.mulf %224, %225 : vector<64x128xf32>
    %227 = vector.broadcast %7 : vector<1x128xf32> to vector<64x128xf32>
    %228 = arith.addf %226, %227 : vector<64x128xf32>
    %229 = arith.mulf %228, %0 : vector<64x128xf32>
    %c64_i32_89 = arith.constant 64 : i32
    %230 = tpu.dynamic_rotate %228 by %c64_i32_89 dim 1 : vector<64x128xf32>, i32 -> vector<64x128xf32>
    %231 = arith.mulf %230, %1 : vector<64x128xf32>
    %232 = arith.addf %229, %231 : vector<64x128xf32>
    %233 = arith.mulf %206, %2 : vector<8x128xf32>
    %c64_i32_90 = arith.constant 64 : i32
    %234 = tpu.dynamic_rotate %206 by %c64_i32_90 dim 1 : vector<8x128xf32>, i32 -> vector<8x128xf32>
    %235 = arith.mulf %234, %3 : vector<8x128xf32>
    %236 = arith.addf %233, %235 : vector<8x128xf32>
    %cst_91 = arith.constant dense<0.000000e+00> : vector<8x64xf32>
    %237 = tpu.matmul %4, %232, %cst_91 {dimension_numbers = #tpu.dot_dimension_numbers<[1], [1], [0], [0], [0, 0, 1, 0], [], []>} : vector<8x128xf32>, vector<64x128xf32>, vector<8x64xf32> -> vector<8x64xf32>
    %cst_92 = arith.constant dense<0xFF800000> : vector<8xf32>
    %238 = vector.multi_reduction <maximumf>, %237, %cst_92 [1] : vector<8x64xf32> to vector<8xf32>
    %239 = vector.shape_cast %238 : vector<8xf32> to vector<8x1xf32>
    %240 = vector.broadcast %239 : vector<8x1xf32> to vector<8x64xf32>
    %241 = arith.subf %237, %240 : vector<8x64xf32>
    %242 = math.exp %241 : vector<8x64xf32>
    %cst_93 = arith.constant dense<0.000000e+00> : vector<8xf32>
    %243 = vector.multi_reduction <add>, %242, %cst_93 [1] : vector<8x64xf32> to vector<8xf32>
    %244 = vector.shape_cast %243 : vector<8xf32> to vector<8x1xf32>
    %245 = vector.broadcast %244 : vector<8x1xf32> to vector<8x64xf32>
    %246 = arith.divf %242, %245 : vector<8x64xf32>
    %cst_94 = arith.constant dense<0.000000e+00> : vector<8x128xf32>
    %247 = tpu.matmul %246, %232, %cst_94 {dimension_numbers = #tpu.dot_dimension_numbers<[1], [0], [0], [1], [0, 0, 1, 1], [], []>} : vector<8x64xf32>, vector<64x128xf32>, vector<8x128xf32> -> vector<8x128xf32>
    %cst_95 = arith.constant dense<0.000000e+00> : vector<8x128xf32>
    %248 = tpu.matmul %247, %8, %cst_95 {dimension_numbers = #tpu.dot_dimension_numbers<[1], [0], [0], [1], [0, 0, 1, 1], [], []>} : vector<8x128xf32>, vector<128x128xf32>, vector<8x128xf32> -> vector<8x128xf32>
    %cst_96 = arith.constant dense<0.000000e+00> : vector<1x8xf32>
    %249 = tpu.matmul %5, %236, %cst_96 {dimension_numbers = #tpu.dot_dimension_numbers<[1], [1], [0], [0], [0, 0, 1, 0], [], []>} : vector<1x128xf32>, vector<8x128xf32>, vector<1x8xf32> -> vector<1x8xf32>
    %cst_97 = arith.constant dense<0xFF800000> : vector<1xf32>
    %250 = vector.multi_reduction <maximumf>, %249, %cst_97 [1] : vector<1x8xf32> to vector<1xf32>
    %251 = vector.shape_cast %250 : vector<1xf32> to vector<1x1xf32>
    %252 = vector.broadcast %251 : vector<1x1xf32> to vector<1x8xf32>
    %253 = arith.subf %249, %252 : vector<1x8xf32>
    %254 = math.exp %253 : vector<1x8xf32>
    %cst_98 = arith.constant dense<0.000000e+00> : vector<1xf32>
    %255 = vector.multi_reduction <add>, %254, %cst_98 [1] : vector<1x8xf32> to vector<1xf32>
    %256 = vector.shape_cast %255 : vector<1xf32> to vector<1x1xf32>
    %257 = vector.broadcast %256 : vector<1x1xf32> to vector<1x8xf32>
    %258 = arith.divf %254, %257 : vector<1x8xf32>
    %cst_99 = arith.constant dense<0.000000e+00> : vector<1x128xf32>
    %259 = tpu.matmul %258, %236, %cst_99 {dimension_numbers = #tpu.dot_dimension_numbers<[1], [0], [0], [1], [0, 0, 1, 1], [], []>} : vector<1x8xf32>, vector<8x128xf32>, vector<1x128xf32> -> vector<1x128xf32>
    %260 = tpu.concatenate %248, %259 in 0 : vector<8x128xf32>, vector<1x128xf32> -> vector<9x128xf32>
    %261 = arith.index_cast %c3_i32 : i32 to index
    %c0_100 = arith.constant 0 : index
    %c0_101 = arith.constant 0 : index
    %262 = vector.load %arg11[%261, %c0_100, %c0_101] : memref<4x9x128xf32, #tpu.memory_space<vmem>>, vector<1x9x128xf32>
    %263 = vector.shape_cast %262 : vector<1x9x128xf32> to vector<9x128xf32>
    %264 = vector.shape_cast %260 : vector<9x128xf32> to vector<1x9x128xf32>
    tpu.vector_store %arg11[%261, %c0_100, %c0_101], %264 {strides = array<i32>} : memref<4x9x128xf32, #tpu.memory_space<vmem>>, vector<1x9x128xf32>,
    %c4_i32 = arith.constant 4 : i32
    return
  }
  func.func @transform_0(%arg0: i32) -> (i32, i32, i32) {
    %c0_i32 = arith.constant 0 : i32
    %c0_i32_0 = arith.constant 0 : i32
    %c0_i32_1 = arith.constant 0 : i32
    return %arg0, %c0_i32, %c0_i32_0 : i32, i32, i32
  }
  func.func @transform_1(%arg0: i32) -> (i32, i32) {
    %c0_i32 = arith.constant 0 : i32
    %c0_i32_0 = arith.constant 0 : i32
    %c0_i32_1 = arith.constant 0 : i32
    return %c0_i32, %c0_i32_0 : i32, i32
  }
  func.func @transform_2(%arg0: i32) -> (i32, i32) {
    %c0_i32 = arith.constant 0 : i32
    %c0_i32_0 = arith.constant 0 : i32
    %c0_i32_1 = arith.constant 0 : i32
    return %c0_i32, %c0_i32_0 : i32, i32
  }
  func.func @transform_3(%arg0: i32) -> (i32, i32) {
    %c0_i32 = arith.constant 0 : i32
    %c0_i32_0 = arith.constant 0 : i32
    %c0_i32_1 = arith.constant 0 : i32
    return %c0_i32, %c0_i32_0 : i32, i32
  }
  func.func @transform_4(%arg0: i32) -> (i32, i32) {
    %c0_i32 = arith.constant 0 : i32
    %c0_i32_0 = arith.constant 0 : i32
    %c0_i32_1 = arith.constant 0 : i32
    return %c0_i32, %c0_i32_0 : i32, i32
  }
  func.func @transform_5(%arg0: i32) -> (i32, i32) {
    %c0_i32 = arith.constant 0 : i32
    %c0_i32_0 = arith.constant 0 : i32
    %c0_i32_1 = arith.constant 0 : i32
    return %c0_i32, %c0_i32_0 : i32, i32
  }
  func.func @transform_6(%arg0: i32) -> (i32, i32) {
    %c0_i32 = arith.constant 0 : i32
    %c0_i32_0 = arith.constant 0 : i32
    %c0_i32_1 = arith.constant 0 : i32
    return %c0_i32, %c0_i32_0 : i32, i32
  }
  func.func @transform_7(%arg0: i32) -> (i32, i32) {
    %c0_i32 = arith.constant 0 : i32
    %c0_i32_0 = arith.constant 0 : i32
    %c0_i32_1 = arith.constant 0 : i32
    return %c0_i32, %c0_i32_0 : i32, i32
  }
  func.func @transform_8(%arg0: i32) -> (i32, i32) {
    %c0_i32 = arith.constant 0 : i32
    %c0_i32_0 = arith.constant 0 : i32
    %c0_i32_1 = arith.constant 0 : i32
    return %c0_i32, %c0_i32_0 : i32, i32
  }
  func.func @transform_9(%arg0: i32) -> (i32, i32) {
    %c0_i32 = arith.constant 0 : i32
    %c0_i32_0 = arith.constant 0 : i32
    %c0_i32_1 = arith.constant 0 : i32
    return %c0_i32, %c0_i32_0 : i32, i32
  }
  func.func @transform_10(%arg0: i32) -> (i32, i32, i32) {
    %c0_i32 = arith.constant 0 : i32
    %c0_i32_0 = arith.constant 0 : i32
    %c0_i32_1 = arith.constant 0 : i32
    return %arg0, %c0_i32, %c0_i32_0 : i32, i32, i32
  }
}

</mosaic_0001>

<bundles_post_ra>
// kernel: spatial_time_slot_pool.1
= control target key start
LH: loop header
LB: loop body
LE: loop exit
PB: predicated region body
PF: predicated region fallthrough
CT: control target
= control target key end

     0   :  { %s1808_s19 = smov 64   ;;  %v1809_v17 = vmov 128.0   ;;  %vm424_vm1 = vcmask 57344   ;;  %s3206_s0 = inlined_call_operand.vmem [shape: f32[4,72,128], index: 0, kind: input, shape index: {}]   ;;  %s3207_s3 = inlined_call_operand.vmem [shape: f32[8,128], index: 3, kind: input, shape index: {}]   ;;  %s3208_s4 = inlined_call_operand.vmem [shape: f32[8,128], index: 4, kind: input, shape index: {}]   ;;  %s3209_s6 = inlined_call_operand.vmem [shape: f32[1,128], index: 6, kind: input, shape index: {}]   ;;  %s3210_s7 = inlined_call_operand.vmem [shape: f32[1,128], index: 7, kind: input, shape index: {}]   ;;  %s3211_s8 = inlined_call_operand.vmem [shape: f32[1,128], index: 8, kind: input, shape index: {}]   ;;  %s3212_s1 = inlined_call_operand.vmem [shape: f32[64,128], index: 1, kind: input, shape index: {}]   ;;  %s3213_s2 = inlined_call_operand.vmem [shape: f32[64,128], index: 2, kind: input, shape index: {}]   ;;  %s3214_s5 = inlined_call_operand.vmem [shape: f32[8,128], index: 5, kind: input, shape index: {}]   ;;  %s3215_s10 = inlined_call_operand.vmem [shape: f32[4,9,128], index: 10, kind: output, shape index: {}]   ;;  %s3216_s9 = inlined_call_operand.vmem [shape: f32[128,128], index: 9, kind: input, shape index: {}]  }
   0x1   :  { %v1652_v0 = vld [vmem:[%s3206_s0 + $0x80] sm:$0xff]  ;;  %v1871_v1 = vld [vmem:[%s3206_s0 + $0x78] sm:$0xff]  ;;  %v79_v3 = vld [vmem:[%s3206_s0 + $0x30] sm:$0xff]  ;;  %1688 = vrcp.f32 %v1809_v17 }
   0x2   :  { %499 = vadd.xlane.f32.xlu1 %v1652_v0  ;;  %497 = vadd.xlane.f32.xlu2 %v1871_v1  ;;  %v81_v2 = vld [vmem:[%s3206_s0 + $0x40] sm:$0xff]  ;;  %v78_v4 = vld [vmem:[%s3206_s0 + $0x28] sm:$0xff]  ;;  %v1887_v5 = vld [vmem:[%s3206_s0 + $0x70] sm:$0xff] }
   0x3   :  { %312 = vrot.lane.b32.xlu0 %v81_v2, %s1808_s19  ;;  %v1892_v6 = vld [vmem:[%s3206_s0 + $0x20] sm:$0xff]  ;;  %v1899_v7 = vld [vmem:[%s3206_s0 + $0x68] sm:$0xff]  ;;  %v1904_v8 = vld [vmem:[%s3206_s0 + $0x18] sm:$0xff] }
   0x4   :  { %v1911_v9 = vld [vmem:[%s3206_s0 + $0x60] sm:$0xff]  ;;  %v1916_v10 = vld [vmem:[%s3206_s0 + $0x10] sm:$0xff]  ;;  %v1923_v11 = vld [vmem:[%s3206_s0 + $0x58] sm:$0xff] }
   0x5   :  { %v1928_v12 = vld [vmem:[%s3206_s0 + $0x8] sm:$0xff]  ;;  %v1934_v13 = vld [vmem:[%s3206_s0 + $0x38] sm:$0xff]  ;;  %v1941_v14 = vld [vmem:[%s3206_s0 + $0x50] sm:$0xff] }
   0x6   :  { %v1946_v15 = vld [vmem:[%s3206_s0] sm:$0xff]  ;;  %v1952_v16 = vld [vmem:[%s3206_s0 + $0x48] sm:$0xff] }
   0x7   :  { %v1689_v18 = vpop.eup %1688  ;;  %v51_v23 = vld [vmem:[%s3207_s3] sm:$0xff] }
   0x8   :  { %v99_v19 = vmul.f32 128.0, %v1689_v18  ;;  %vm103_vm0 = vweird.f32 %v1689_v18  ;;  %v52_v24 = vld [vmem:[%s3208_s4] sm:$0xff]  ;;  %v311_v26 = vmul.f32 %v81_v2, %v51_v23 }
   0x9   :  { %v54_v34 = vld [vmem:[%s3209_s6] sm:$0x1] }
   0xa   :  { %94 = vadd.xlane.f32.xlu1 %v79_v3  ;;  %92 = vadd.xlane.f32.xlu2 %v78_v4  ;;  %v100_v20 = vsub.f32 1.0, %v99_v19 }
   0xc   :  { %v101_v21 = vmul.f32 %v1689_v18, %v100_v20 }
   0xe   :  { %v102_v22 = vadd.f32 %v1689_v18, %v101_v21 }
  0x10   :  { %v1962_v25 = vsel %vm103_vm0, %v1689_v18, %v102_v22 }
  0x11   :  { %3222 = vst [vmem:[#allocation2_spill] sm:$0xff] %v1962_v25 }
  0x12   :  { %495 = vadd.xlane.f32.xlu1 %v1887_v5  ;;  %90 = vadd.xlane.f32.xlu2 %v1892_v6 }
  0x1a   :  { %493 = vadd.xlane.f32.xlu1 %v1899_v7  ;;  %88 = vadd.xlane.f32.xlu2 %v1904_v8 }
  0x22   :  { %491 = vadd.xlane.f32.xlu1 %v1911_v9  ;;  %86 = vadd.xlane.f32.xlu2 %v1916_v10 }
  0x2a   :  { %489 = vadd.xlane.f32.xlu1 %v1923_v11  ;;  %84 = vadd.xlane.f32.xlu2 %v1928_v12 }
  0x2d   :  { %96 = vadd.xlane.f32.xlu0 %v1934_v13 }
  0x32   :  { %487 = vadd.xlane.f32.xlu1 %v1941_v14  ;;  %82 = vadd.xlane.f32.xlu2 %v1946_v15 }
  0x35   :  { %485 = vadd.xlane.f32.xlu0 %v1952_v16 }
  0x75   :  { %v313_v27 = vpop.permute.xlu0 %312  ;;  %v500_v28 = vpop.xlane.xlu1 %499 }
  0x76   :  { %v314_v29 = vmul.f32 %v313_v27, %v52_v24  ;;  %v508_v30 = vmul.f32 %v500_v28, %v1962_v25  ;;  %v498_v31 = vpop.xlane.xlu2 %497 }
  0x78   :  { %v1965_v32 = vsub.f32 %v1652_v0, %v508_v30  ;;  %v315_v33 = vadd.f32 %v314_v29, %v311_v26 }
  0x7a   :  { %419 = vmatpush.xpose.msra.mxu3 %v315_v33  ;;  %v524_v35 = vmul.f32 %v1965_v32, %v1965_v32 }
  0x7c   :  { %539 = vadd.xlane.f32.xlu2 %v524_v35 }
  0x7d   :  { %420 = vmatmul.f32.vlgmr.msra.gmra.mxu3 %v54_v34  ;;  %v95_v36 = vpop.xlane.xlu1 %94 }
  0x7e   :  { %468 = vmatpush.msrb.mxu3 %v315_v33  ;;  %v111_v37 = vmul.f32 %v1962_v25, %v95_v36  ;;  %v93_v38 = vpop.xlane.xlu2 %92 }
  0x7f   :  { %v110_v39 = vmul.f32 %v1962_v25, %v93_v38 }
  0x80   :  { %v1974_v40 = vsub.f32 %v79_v3, %v111_v37 }
  0x81   :  { %v1976_v41 = vsub.f32 %v78_v4, %v110_v39 }
  0x82   :  { %v127_v42 = vmul.f32 %v1974_v40, %v1974_v40 }
  0x83   :  { %v126_v43 = vmul.f32 %v1976_v41, %v1976_v41 }
  0x84   :  { %141 = vadd.xlane.f32.xlu0 %v127_v42 }
  0x85   :  { %139 = vadd.xlane.f32.xlu2 %v126_v43  ;;  %v496_v44 = vpop.xlane.xlu1 %495 }
  0x86   :  { %v506_v45 = vmul.f32 %v496_v44, %v1962_v25  ;;  %v91_v46 = vpop.xlane.xlu2 %90 }
  0x87   :  { %v109_v21 = vmul.f32 %v1962_v25, %v91_v46 }
  0x88   :  { %v1984_v47 = vsub.f32 %v1887_v5, %v506_v45  ;;  %v507_v5 = vmul.f32 %v498_v31, %v1962_v25 }
  0x8a   :  { %v522_v48 = vmul.f32 %v1984_v47, %v1984_v47 }
  0x8c   :  { %535 = vadd.xlane.f32.xlu0 %v522_v48 }
  0x8d   :  { %v494_v49 = vpop.xlane.xlu1 %493 }
  0x8e   :  { %v505_v50 = vmul.f32 %v494_v49, %v1962_v25  ;;  %v89_v51 = vpop.xlane.xlu2 %88 }
  0x8f   :  { %v108_v52 = vmul.f32 %v1962_v25, %v89_v51 }
  0x90   :  { %v1991_v53 = vsub.f32 %v1899_v7, %v505_v50 }
  0x91   :  { %v1994_v54 = vsub.f32 %v1904_v8, %v108_v52 }
  0x92   :  { %v521_v55 = vmul.f32 %v1991_v53, %v1991_v53 }
  0x93   :  { %v124_v56 = vmul.f32 %v1994_v54, %v1994_v54 }
  0x94   :  { %533 = vadd.xlane.f32.xlu2 %v521_v55 }
  0x95   :  { %135 = vadd.xlane.f32.xlu0 %v124_v56  ;;  %v492_v57 = vpop.xlane.xlu1 %491 }
  0x96   :  { %v87_v58 = vpop.xlane.xlu2 %86  ;;  %v504_v24 = vmul.f32 %v492_v57, %v1962_v25 }
  0x97   :  { %v107_v59 = vmul.f32 %v1962_v25, %v87_v58  ;;  %v2070_v58 = vld [vmem:[%s3210_s7] ss:$0 sm:$0xff] }
  0x99   :  { %v2002_v60 = vsub.f32 %v1916_v10, %v107_v59 }
  0x9b   :  { %v123_v61 = vmul.f32 %v2002_v60, %v2002_v60 }
  0x9d   :  { %133 = vadd.xlane.f32.xlu2 %v123_v61  ;;  %v490_v62 = vpop.xlane.xlu1 %489 }
  0x9e   :  { %v503_v63 = vmul.f32 %v490_v62, %v1962_v25  ;;  %v85_v27 = vpop.xlane.xlu2 %84  ;;  %v2075_v62 = vld [vmem:[%s3211_s8] ss:$0 sm:$0xff] }
  0x9f   :  { %v106_v29 = vmul.f32 %v1962_v25, %v85_v27 }
  0xa0   :  { %v2008_v0 = vsub.f32 %v1923_v11, %v503_v63  ;;  %v97_v2 = vpop.xlane.xlu0 %96  ;;  %v2021_v11 = vsub.f32 %v1871_v1, %v507_v5 }
  0xa1   :  { %v112_v3 = vmul.f32 %v1962_v25, %v97_v2 }
  0xa2   :  { %v519_v4 = vmul.f32 %v2008_v0, %v2008_v0  ;;  %v523_v23 = vmul.f32 %v2021_v11, %v2021_v11 }
  0xa3   :  { %v2015_v7 = vsub.f32 %v1934_v13, %v112_v3 }
  0xa4   :  { %529 = vadd.xlane.f32.xlu0 %v519_v4 }
  0xa5   :  { %v488_v8 = vpop.xlane.xlu1 %487  ;;  %v128_v10 = vmul.f32 %v2015_v7, %v2015_v7 }
  0xa6   :  { %v502_v17 = vmul.f32 %v488_v8, %v1962_v25  ;;  %v83_v30 = vpop.xlane.xlu2 %82 }
  0xa7   :  { %143 = vadd.xlane.f32.xlu1 %v128_v10  ;;  %v105_v33 = vmul.f32 %v1962_v25, %v83_v30 }
  0xa8   :  { %v2024_v18 = vsub.f32 %v1941_v14, %v502_v17  ;;  %v486_v19 = vpop.xlane.xlu0 %485  ;;  %v2038_v14 = vsub.f32 %v1892_v6, %v109_v21  ;;  %v2050_v6 = vsub.f32 %v1928_v12, %v106_v29 }
  0xa9   :  { %v501_v20 = vmul.f32 %v486_v19, %v1962_v25 }
  0xaa   :  { %v518_v13 = vmul.f32 %v2024_v18, %v2024_v18  ;;  %v125_v26 = vmul.f32 %v2038_v14, %v2038_v14  ;;  %v122_v31 = vmul.f32 %v2050_v6, %v2050_v6 }
  0xab   :  { %v2031_v22 = vsub.f32 %v1952_v16, %v501_v20  ;;  %v2044_v16 = vsub.f32 %v1911_v9, %v504_v24  ;;  %v2056_v9 = vsub.f32 %v1946_v15, %v105_v33 }
  0xac   :  { %527 = vadd.xlane.f32.xlu0 %v518_v13 }
  0xad   :  { %v517_v1 = vmul.f32 %v2031_v22, %v2031_v22  ;;  %v520_v28 = vmul.f32 %v2044_v16, %v2044_v16  ;;  %v121_v34 = vmul.f32 %v2056_v9, %v2056_v9 }
  0xaf   :  { %537 = vadd.xlane.f32.xlu1 %v523_v23  ;;  %525 = vadd.xlane.f32.xlu2 %v517_v1 }
  0xb7   :  { %137 = vadd.xlane.f32.xlu1 %v125_v26 }
  0xbf   :  { %531 = vadd.xlane.f32.xlu1 %v520_v28 }
  0xc7   :  { %131 = vadd.xlane.f32.xlu1 %v122_v31 }
  0xcf   :  { %129 = vadd.xlane.f32.xlu1 %v121_v34 }
  0xef   :  { %v540_v35 = vpop.xlane.xlu2 %539 }
  0xf0   :  { %v548_v36 = vmul.f32 %v540_v35, %v1962_v25 }
  0xf2   :  { %v556_v37 = vadd.f32 1e-05, %v548_v36 }
  0xf4   :  { %1690 = vrsqrt.f32 %v556_v37  ;;  %vm633_vm2 = vweird.f32 %v556_v37 }
  0xf7   :  { %v142_v12 = vpop.xlane.xlu0 %141 }
  0xf8   :  { %v151_v38 = vmul.f32 %v142_v12, %v1962_v25  ;;  %v140_v45 = vpop.xlane.xlu2 %139 }
  0xf9   :  { %v150_v27 = vmul.f32 %v140_v45, %v1962_v25 }
  0xfa   :  { %v1691_v39 = vpop.eup %1690  ;;  %v159_v42 = vadd.f32 1e-05, %v151_v38 }
  0xfb   :  { %v628_v43 = vmul.f32 %v1691_v39, %v556_v37  ;;  %vm634_vm3 = vweird.f32 %v1691_v39  ;;  %v2088_v34 = vadd.f32 1e-05, %v150_v27 }
  0xfc   :  { %1692 = vrsqrt.f32 %v159_v42  ;;  %vm635_vm4 = vmor %vm633_vm2, %vm634_vm3  ;;  %vm227_vm5 = vweird.f32 %v159_v42 }
  0xfd   :  { %v629_v44 = vmul.f32 %v1691_v39, %v628_v43  ;;  %vm217_vm2 = vweird.f32 %v2088_v34 }
  0xff   :  { %v630_v15 = vmul.f32 0.5, %v629_v44  ;;  %v536_v46 = vpop.xlane.xlu0 %535 }
 0x100   :  { %v2062_v48 = vpop.f32.mrf.mxu3  ;;  %v546_v49 = vmul.f32 %v536_v46, %v1962_v25 }
 0x101   :  { %v631_v50 = vsub.f32 1.5, %v630_v15  ;;  %v425_v51 = vsel %vm424_vm1, %v2062_v48, -inf }
 0x102   :  { %v1693_v52 = vpop.eup %1692  ;;  %v554_v55 = vadd.f32 1e-05, %v546_v49  ;;  %426 = vmax.xlane.f32.xlu2 %v425_v51 }
 0x103   :  { %v632_v56 = vmul.f32 %v1691_v39, %v631_v50  ;;  %v222_v57 = vmul.f32 %v1693_v52, %v159_v42  ;;  %vm228_vm6 = vweird.f32 %v1693_v52 }
 0x104   :  { %1694 = vrsqrt.f32 %v554_v55  ;;  %vm229_vm7 = vmor %vm227_vm5, %vm228_vm6  ;;  %vm613_vm8 = vweird.f32 %v554_v55 }
 0x105   :  { %v636_v59 = vsel %vm635_vm4, %v1691_v39, %v632_v56  ;;  %v223_v61 = vmul.f32 %v1693_v52, %v222_v57 }
 0x106   :  { %v644_v63 = vmul.f32 %v636_v59, %v1965_v32 }
 0x107   :  { %v224_v2 = vmul.f32 0.5, %v223_v61  ;;  %v534_v3 = vpop.xlane.xlu2 %533 }
 0x108   :  { %v545_v4 = vmul.f32 %v534_v3, %v1962_v25  ;;  %v652_v5 = vmul.f32 %v2070_v58, %v644_v63  ;;  %v136_v36 = vpop.xlane.xlu0 %135 }
 0x109   :  { %v225_v8 = vsub.f32 1.5, %v224_v2  ;;  %v148_v51 = vmul.f32 %v136_v36, %v1962_v25 }
 0x10a   :  { %v1695_v10 = vpop.eup %1694  ;;  %v553_v17 = vadd.f32 1e-05, %v545_v4  ;;  %v2081_v19 = vadd.f32 %v2075_v62, %v652_v5 }
 0x10b   :  { %v226_v20 = vmul.f32 %v1693_v52, %v225_v8  ;;  %v608_v13 = vmul.f32 %v1695_v10, %v554_v55  ;;  %vm614_vm9 = vweird.f32 %v1695_v10  ;;  %v2118_v61 = vadd.f32 1e-05, %v148_v51 }
 0x10c   :  { %1696 = vrsqrt.f32 %v553_v17  ;;  %683 = vrot.lane.b32.xlu1 %v2081_v19, %s1808_s19  ;;  %vm615_vm10 = vmor %vm613_vm8, %vm614_vm9  ;;  %vm603_vm11 = vweird.f32 %v553_v17 }
 0x10d   :  { %v230_v32 = vsel %vm229_vm7, %v1693_v52, %v226_v20  ;;  %v609_v21 = vmul.f32 %v1695_v10, %v608_v13  ;;  %1698 = vrsqrt.f32 %v2088_v34 }
 0x10e   :  { %v247_v1 = vmul.f32 %v230_v32, %v1974_v40 }
 0x10f   :  { %v610_v23 = vmul.f32 0.5, %v609_v21 }
 0x110   :  { %v258_v30 = vmul.f32 %v2070_v58, %v247_v1  ;;  %v134_v4 = vpop.xlane.xlu2 %133 }
 0x111   :  { %v611_v24 = vsub.f32 1.5, %v610_v23 }
 0x112   :  { %v1697_v26 = vpop.eup %1696  ;;  %v2092_v40 = vadd.f32 %v2075_v62, %v258_v30 }
 0x113   :  { %v612_v28 = vmul.f32 %v1695_v10, %v611_v24  ;;  %v598_v29 = vmul.f32 %v1697_v26, %v553_v17  ;;  %vm604_vm12 = vweird.f32 %v1697_v26  ;;  %v2105_v49 = vpop.eup %1698  ;;  %v147_v17 = vmul.f32 %v134_v4, %v1962_v25 }
 0x114   :  { %vm605_vm13 = vmor %vm603_vm11, %vm604_vm12  ;;  %v212_v56 = vmul.f32 %v2105_v49, %v2088_v34  ;;  %vm218_vm3 = vweird.f32 %v2105_v49 }
 0x115   :  { %v616_v31 = vsel %vm615_vm10, %v1695_v10, %v612_v28  ;;  %v599_v33 = vmul.f32 %v1697_v26, %v598_v29  ;;  %v2130_v27 = vadd.f32 1e-05, %v147_v17  ;;  %vm2148_vm6 = vmor %vm217_vm2, %vm218_vm3 }
 0x116   :  { %v642_v35 = vmul.f32 %v616_v31, %v1984_v47  ;;  %v213_v3 = vmul.f32 %v2105_v49, %v212_v56 }
 0x117   :  { %v600_v37 = vmul.f32 0.5, %v599_v33  ;;  %v530_v46 = vpop.xlane.xlu0 %529 }
 0x118   :  { %v650_v12 = vmul.f32 %v2070_v58, %v642_v35  ;;  %v543_v57 = vmul.f32 %v530_v46, %v1962_v25  ;;  %v214_v32 = vmul.f32 0.5, %v213_v3 }
 0x119   :  { %v601_v38 = vsub.f32 1.5, %v600_v37 }
 0x11a   :  { %v144_v39 = vpop.xlane.xlu1 %143  ;;  %291 = vrot.lane.b32.xlu2 %v2092_v40, %s1808_s19  ;;  %v2099_v42 = vadd.f32 %v2075_v62, %v650_v12  ;;  %v2121_v5 = vadd.f32 1e-05, %v543_v57  ;;  %v215_v31 = vsub.f32 1.5, %v214_v32 }
 0x11b   :  { %v602_v47 = vmul.f32 %v1697_v26, %v601_v38  ;;  %v152_v43 = vmul.f32 %v144_v39, %v1962_v25 }
 0x11c   :  { %679 = vrot.lane.b32.xlu1 %v2099_v42, %s1808_s19 }
 0x11d   :  { %v606_v44 = vsel %vm605_vm13, %v1697_v26, %v602_v47  ;;  %v160_v15 = vadd.f32 1e-05, %v152_v43  ;;  %v216_v43 = vmul.f32 %v2105_v49, %v215_v31  ;;  %vm197_vm13 = vweird.f32 %v2118_v61 }
 0x11e   :  { %v641_v45 = vmul.f32 %v606_v44, %v1991_v53 }
 0x11f   :  { %1700 = vrsqrt.f32 %v160_v15  ;;  %v528_v10 = vpop.xlane.xlu0 %527  ;;  %vm237_vm14 = vweird.f32 %v160_v15 }
 0x120   :  { %v649_v50 = vmul.f32 %v2070_v58, %v641_v45  ;;  %v542_v1 = vmul.f32 %v528_v10, %v1962_v25 }
 0x122   :  { %v538_v52 = vpop.xlane.xlu1 %537  ;;  %v2110_v55 = vadd.f32 %v2075_v62, %v649_v50  ;;  %v2135_v35 = vadd.f32 1e-05, %v542_v1  ;;  %v526_v39 = vpop.xlane.xlu2 %525 }
 0x123   :  { %v547_v59 = vmul.f32 %v538_v52, %v1962_v25  ;;  %v541_v51 = vmul.f32 %v526_v39, %v1962_v25 }
 0x124   :  { %677 = vrot.lane.b32.xlu1 %v2110_v55, %s1808_s19 }
 0x125   :  { %v1701_v53 = vpop.eup %1700  ;;  %v555_v63 = vadd.f32 1e-05, %v547_v59  ;;  %v2173_v10 = vadd.f32 1e-05, %v541_v51 }
 0x126   :  { %v232_v2 = vmul.f32 %v1701_v53, %v160_v15  ;;  %vm238_vm15 = vweird.f32 %v1701_v53 }
 0x127   :  { %1702 = vrsqrt.f32 %v555_v63  ;;  %vm239_vm0 = vmor %vm237_vm14, %vm238_vm15  ;;  %vm623_vm4 = vweird.f32 %v555_v63  ;;  %vm583_vm15 = vweird.f32 %v2121_v5 }
 0x128   :  { %v233_v8 = vmul.f32 %v1701_v53, %v232_v2  ;;  %1704 = vrsqrt.f32 %v2118_v61 }
 0x129   :  { %1706 = vrsqrt.f32 %v2121_v5 }
 0x12a   :  { %v234_v20 = vmul.f32 0.5, %v233_v8  ;;  %v138_v13 = vpop.xlane.xlu1 %137 }
 0x12b   :  { %v149_v21 = vmul.f32 %v138_v13, %v1962_v25 }
 0x12c   :  { %v235_v23 = vsub.f32 1.5, %v234_v20 }
 0x12d   :  { %v1703_v24 = vpop.eup %1702  ;;  %v2128_v26 = vadd.f32 1e-05, %v149_v21 }
 0x12e   :  { %v236_v28 = vmul.f32 %v1701_v53, %v235_v23  ;;  %v618_v29 = vmul.f32 %v1703_v24, %v555_v63  ;;  %v2132_v30 = vpop.eup %1704  ;;  %vm624_vm5 = vweird.f32 %v1703_v24 }
 0x12f   :  { %1708 = vrsqrt.f32 %v2128_v26  ;;  %v2137_v37 = vpop.eup %1706  ;;  %v192_v44 = vmul.f32 %v2132_v30, %v2118_v61  ;;  %vm625_vm7 = vmor %vm623_vm4, %vm624_vm5  ;;  %vm207_vm8 = vweird.f32 %v2128_v26  ;;  %vm198_vm14 = vweird.f32 %v2132_v30 }
 0x130   :  { %v240_v33 = vsel %vm239_vm0, %v1701_v53, %v236_v28  ;;  %v619_v36 = vmul.f32 %v1703_v24, %v618_v29  ;;  %1710 = vrsqrt.f32 %v2130_v27  ;;  %v220_v53 = vsel %vm2148_vm6, %v2105_v49, %v216_v43  ;;  %vm2225_vm3 = vmor %vm197_vm13, %vm198_vm14 }
 0x131   :  { %v248_v12 = vmul.f32 %v240_v33, %v2015_v7  ;;  %v578_v7 = vmul.f32 %v2137_v37, %v2121_v5  ;;  %1712 = vrsqrt.f32 %v2135_v35  ;;  %v193_v63 = vmul.f32 %v2132_v30, %v192_v44 }
 0x132   :  { %v620_v38 = vmul.f32 0.5, %v619_v36  ;;  %v532_v47 = vpop.xlane.xlu1 %531  ;;  %v246_v32 = vmul.f32 %v220_v53, %v1976_v41  ;;  %vm584_vm0 = vweird.f32 %v2137_v37  ;;  %vm187_vm5 = vweird.f32 %v2130_v27 }
 0x133   :  { %v544_v15 = vmul.f32 %v532_v47, %v1962_v25  ;;  %v259_v34 = vmul.f32 %v2070_v58, %v248_v12  ;;  %v579_v3 = vmul.f32 %v2137_v37, %v578_v7  ;;  %v194_v21 = vmul.f32 0.5, %v193_v63  ;;  %vm2233_vm4 = vmor %vm583_vm15, %vm584_vm0 }
 0x134   :  { %v621_v46 = vsub.f32 1.5, %v620_v38 }
 0x135   :  { %v2155_v50 = vpop.eup %1708  ;;  %v552_v52 = vadd.f32 1e-05, %v544_v15  ;;  %v2159_v56 = vadd.f32 %v2075_v62, %v259_v34  ;;  %v580_v28 = vmul.f32 0.5, %v579_v3  ;;  %v195_v39 = vsub.f32 1.5, %v194_v21 }
 0x136   :  { %v622_v57 = vmul.f32 %v1703_v24, %v621_v46  ;;  %v202_v59 = vmul.f32 %v2155_v50, %v2128_v26  ;;  %v2169_v2 = vpop.eup %1710  ;;  %vm208_vm9 = vweird.f32 %v2155_v50  ;;  %v257_v26 = vmul.f32 %v2070_v58, %v246_v32 }
 0x137   :  { %1714 = vrsqrt.f32 %v552_v52  ;;  %293 = vrot.lane.b32.xlu0 %v2159_v56, %s1808_s19  ;;  %v2176_v20 = vpop.eup %1712  ;;  %v182_v23 = vmul.f32 %v2169_v2, %v2130_v27  ;;  %vm2194_vm10 = vmor %vm207_vm8, %vm208_vm9  ;;  %v581_v44 = vsub.f32 1.5, %v580_v28  ;;  %vm593_vm11 = vweird.f32 %v552_v52 }
 0x138   :  { %v626_v4 = vsel %vm625_vm7, %v1703_v24, %v622_v57  ;;  %v203_v8 = vmul.f32 %v2155_v50, %v202_v59  ;;  %v568_v31 = vmul.f32 %v2176_v20, %v2135_v35  ;;  %1716 = vrsqrt.f32 %v2173_v10 }
 0x139   :  { %v643_v17 = vmul.f32 %v626_v4, %v2021_v11  ;;  %v183_v43 = vmul.f32 %v2169_v2, %v182_v23  ;;  %v2213_v57 = vadd.f32 %v2075_v62, %v257_v26  ;;  %v196_v59 = vmul.f32 %v2132_v30, %v195_v39 }
 0x13a   :  { %v204_v49 = vmul.f32 0.5, %v203_v8  ;;  %v132_v13 = vpop.xlane.xlu1 %131  ;;  %v569_v15 = vmul.f32 %v2176_v20, %v568_v31  ;;  %v582_v3 = vmul.f32 %v2137_v37, %v581_v44  ;;  %vm188_vm6 = vweird.f32 %v2169_v2 }
 0x13b   :  { %v146_v1 = vmul.f32 %v132_v13, %v1962_v25  ;;  %v651_v24 = vmul.f32 %v2070_v58, %v643_v17  ;;  %v184_v63 = vmul.f32 0.5, %v183_v43  ;;  %vm573_vm7 = vweird.f32 %v2135_v35  ;;  %vm2264_vm9 = vmor %vm187_vm5, %vm188_vm6 }
 0x13c   :  { %v205_v29 = vsub.f32 1.5, %v204_v49  ;;  %v570_v17 = vmul.f32 0.5, %v569_v15  ;;  %vm574_vm8 = vweird.f32 %v2176_v20 }
 0x13d   :  { %v1715_v11 = vpop.eup %1714  ;;  %v2188_v41 = vadd.f32 1e-05, %v146_v1  ;;  %v2191_v33 = vadd.f32 %v2075_v62, %v651_v24  ;;  %v185_v21 = vsub.f32 1.5, %v184_v63  ;;  %v586_v24 = vsel %vm2233_vm4, %v2137_v37, %v582_v3 }
 0x13e   :  { %v206_v36 = vmul.f32 %v2155_v50, %v205_v29  ;;  %v588_v12 = vmul.f32 %v1715_v11, %v552_v52  ;;  %vm594_vm12 = vweird.f32 %v1715_v11  ;;  %v2207_v46 = vpop.eup %1716  ;;  %v200_v52 = vsel %vm2225_vm3, %v2132_v30, %v196_v59 }
 0x13f   :  { %1718 = vrsqrt.f32 %v2188_v41  ;;  %681 = vrot.lane.b32.xlu0 %v2191_v33, %s1808_s19  ;;  %vm595_vm2 = vmor %vm593_vm11, %vm594_vm12  ;;  %v558_v5 = vmul.f32 %v2207_v46, %v2173_v10  ;;  %v571_v28 = vsub.f32 1.5, %v570_v17  ;;  %v186_v37 = vmul.f32 %v2169_v2, %v185_v21 }
 0x140   :  { %v589_v47 = vmul.f32 %v1715_v11, %v588_v12  ;;  %v210_v34 = vsel %vm2194_vm10, %v2155_v50, %v206_v36  ;;  %v639_v27 = vmul.f32 %v586_v24, %v2008_v0  ;;  %vm2270_vm10 = vmor %vm573_vm7, %vm574_vm8  ;;  %vm563_vm11 = vweird.f32 %v2173_v10 }
 0x141   :  { %v245_v4 = vmul.f32 %v210_v34, %v2038_v14  ;;  %v559_v29 = vmul.f32 %v2207_v46, %v558_v5  ;;  %v572_v35 = vmul.f32 %v2176_v20, %v571_v28  ;;  %v190_v0 = vsel %vm2264_vm9, %v2169_v2, %v186_v37 }
 0x142   :  { %v590_v45 = vmul.f32 0.5, %v589_v47  ;;  %v130_v7 = vpop.xlane.xlu1 %129  ;;  %v647_v44 = vmul.f32 %v2070_v58, %v639_v27  ;;  %vm564_vm12 = vweird.f32 %v2207_v46  ;;  %vm177_vm13 = vweird.f32 %v2188_v41 }
 0x143   :  { %v145_v51 = vmul.f32 %v130_v7, %v1962_v25  ;;  %v256_v23 = vmul.f32 %v2070_v58, %v245_v4  ;;  %v560_v26 = vmul.f32 0.5, %v559_v29  ;;  %v576_v15 = vsel %vm2270_vm10, %v2176_v20, %v572_v35  ;;  %vm2299_vm15 = vmor %vm563_vm11, %vm564_vm12 }
 0x144   :  { %v591_v50 = vsub.f32 1.5, %v590_v45  ;;  %v638_v59 = vmul.f32 %v576_v15, %v2024_v18  ;;  %v243_v20 = vmul.f32 %v190_v0, %v2002_v60  ;;  %v2386_v0 = vld [vmem:[%s3213_s2 + $0x28] sm:$0xff]  ;;  %vm449_vm9 = vcmask 64512  }
 0x145   :  { %v2218_v53 = vpop.eup %1718  ;;  %v2222_v61 = vadd.f32 1e-05, %v145_v51  ;;  %v2258_v36 = vadd.f32 %v2075_v62, %v256_v23  ;;  %v561_v34 = vsub.f32 1.5, %v560_v26  ;;  %v2294_v51 = vadd.f32 %v2075_v62, %v647_v44 }
 0x146   :  { %v592_v49 = vmul.f32 %v1715_v11, %v591_v50  ;;  %v172_v13 = vmul.f32 %v2218_v53, %v2188_v41  ;;  %vm178_vm14 = vweird.f32 %v2218_v53  ;;  %v646_v18 = vmul.f32 %v2070_v58, %v638_v59 }
 0x147   :  { %1720 = vrsqrt.f32 %v2222_v61  ;;  %289 = vrot.lane.b32.xlu0 %v2213_v57, %s1808_s19  ;;  %v562_v50 = vmul.f32 %v2207_v46, %v561_v34  ;;  %vm179_vm0 = vmor %vm177_vm13, %vm178_vm14  ;;  %v254_v60 = vmul.f32 %v2070_v58, %v243_v20  ;;  %v2412_v20 = vld [vmem:[%s3212_s1 + $0x20] sm:$0xff]  ;;  %vm336_vm10 = vcmask 523264  }
 0x148   :  { %v596_v14 = vsel %vm595_vm2, %v1715_v11, %v592_v49  ;;  %v173_v31 = vmul.f32 %v2218_v53, %v172_v13  ;;  %vm167_vm2 = vweird.f32 %v2222_v61  ;;  %v2316_v17 = vadd.f32 %v2075_v62, %v646_v18 }
 0x149   :  { %v640_v1 = vmul.f32 %v596_v14, %v2044_v16  ;;  %v244_v16 = vmul.f32 %v200_v52, %v1994_v54  ;;  %v566_v3 = vsel %vm2299_vm15, %v2207_v46, %v562_v50  ;;  %v2319_v5 = vadd.f32 %v2075_v62, %v254_v60 }
 0x14a   :  { %v174_v39 = vmul.f32 0.5, %v173_v31  ;;  %v637_v13 = vmul.f32 %v566_v3, %v2031_v22  ;;  %v2427_v3 = vld [vmem:[%s3213_s2 + $0x18] sm:$0xff] }
 0x14b   :  { %v648_v30 = vmul.f32 %v2070_v58, %v640_v1  ;;  %v255_v43 = vmul.f32 %v2070_v58, %v244_v16  ;;  %v2370_v16 = vld [vmem:[%s3213_s2 + $0x30] sm:$0xff] }
 0x14c   :  { %v175_v45 = vsub.f32 1.5, %v174_v39 }
 0x14d   :  { %v1721_v11 = vpop.eup %1720  ;;  %v2261_v12 = vadd.f32 %v2075_v62, %v648_v30  ;;  %v2291_v2 = vadd.f32 %v2075_v62, %v255_v43 }
 0x14e   :  { %v162_v54 = vmul.f32 %v1721_v11, %v2222_v61  ;;  %v176_v41 = vmul.f32 %v2218_v53, %v175_v45  ;;  %vm168_vm3 = vweird.f32 %v1721_v11 }
 0x14f   :  { %287 = vrot.lane.b32.xlu0 %v2258_v36, %s1808_s19  ;;  %675 = vrot.lane.b32.xlu1 %v2261_v12, %s1808_s19  ;;  %vm169_vm4 = vmor %vm167_vm2, %vm168_vm3 }
 0x150   :  { %v163_v7 = vmul.f32 %v1721_v11, %v162_v54  ;;  %v180_v4 = vsel %vm179_vm0, %v2218_v53, %v176_v41  ;;  %v645_v53 = vmul.f32 %v2070_v58, %v637_v13 }
 0x151   :  { %v242_v49 = vmul.f32 %v180_v4, %v2050_v6 }
 0x152   :  { %v164_v63 = vmul.f32 0.5, %v163_v7  ;;  %v2333_v6 = vadd.f32 %v2075_v62, %v645_v53  ;;  %v2404_v7 = vld [vmem:[%s3213_s2 + $0x20] sm:$0xff] }
 0x153   :  { %v253_v46 = vmul.f32 %v2070_v58, %v242_v49 }
 0x154   :  { %v165_v8 = vsub.f32 1.5, %v164_v63  ;;  %v665_v63 = vmul.f32 %v2110_v55, %v2412_v20 }
 0x155   :  { %v2330_v14 = vadd.f32 %v2075_v62, %v253_v46 }
 0x156   :  { %v166_v32 = vmul.f32 %v1721_v11, %v165_v8 }
 0x157   :  { %285 = vrot.lane.b32.xlu0 %v2291_v2, %s1808_s19  ;;  %673 = vrot.lane.b32.xlu1 %v2294_v51, %s1808_s19 }
 0x158   :  { %v170_v61 = vsel %vm169_vm4, %v1721_v11, %v166_v32  ;;  %v275_v32 = vmul.f32 %v2258_v36, %v2412_v20 }
 0x159   :  { %v241_v22 = vmul.f32 %v170_v61, %v2056_v9  ;;  %v2350_v9 = vld [vmem:[%s3212_s1 + $0x38] sm:$0xff]  ;;  %v2443_v61 = vld [vmem:[%s3213_s2 + $0x10] sm:$0xff] }
 0x15a   :  { %v668_v28 = vmul.f32 %v2081_v19, %v2350_v9  ;;  %v2375_v19 = vld [vmem:[%s3212_s1 + $0x30] sm:$0xff]  ;;  %v278_v35 = vmul.f32 %v2159_v56, %v2350_v9 }
 0x15b   :  { %v252_v52 = vmul.f32 %v2070_v58, %v241_v22  ;;  %v2355_v58 = vld [vmem:[%s3213_s2 + $0x38] sm:$0xff]  ;;  %v277_v54 = vmul.f32 %v2092_v40, %v2375_v19  ;;  %v667_v44 = vmul.f32 %v2191_v33, %v2375_v19  ;;  %v2397_v40 = vld [vmem:[%s3212_s1 + $0x28] sm:$0xff] }
 0x15c   :  { %v666_v45 = vmul.f32 %v2099_v42, %v2397_v40  ;;  %v276_v41 = vmul.f32 %v2213_v57, %v2397_v40  ;;  %v2432_v57 = vld [vmem:[%s3212_s1 + $0x18] sm:$0xff] }
 0x15d   :  { %v2342_v21 = vadd.f32 %v2075_v62, %v252_v52  ;;  %v664_v49 = vmul.f32 %v2261_v12, %v2432_v57  ;;  %v2448_v12 = vld [vmem:[%s3212_s1 + $0x10] sm:$0xff] }
 0x15e   :  { %v663_v36 = vmul.f32 %v2294_v51, %v2448_v12 }
 0x15f   :  { %671 = vrot.lane.b32.xlu1 %v2316_v17, %s1808_s19  ;;  %283 = vrot.lane.b32.xlu0 %v2319_v5, %s1808_s19 }
 0x167   :  { %281 = vrot.lane.b32.xlu0 %v2330_v14, %s1808_s19  ;;  %669 = vrot.lane.b32.xlu1 %v2333_v6, %s1808_s19 }
 0x16f   :  { %279 = vrot.lane.b32.xlu0 %v2342_v21, %s1808_s19 }
 0x175   :  { %v427_v23 = vpop.xlane.xlu2 %426 }
 0x176   :  { %v428_v1 = vsub.f32 %v2062_v48, %v427_v23 }
 0x178   :  { %v429_v24 = vmul.f32 1.442695, %v428_v1 }
 0x17a   :  { %1722 = vpow2.f32 %v429_v24  ;;  %v274_v24 = vmul.f32 %v2291_v2, %v2432_v57 }
 0x17d   :  { %v292_v11 = vpop.permute.xlu2 %291 }
 0x17e   :  { %v684_v62 = vpop.permute.xlu1 %683  ;;  %v301_v27 = vmul.f32 %v292_v11, %v2370_v16 }
 0x17f   :  { %v692_v29 = vmul.f32 %v684_v62, %v2355_v58 }
 0x180   :  { %v2360_v31 = vpop.eup %1722  ;;  %v309_v47 = vadd.f32 %v301_v27, %v277_v54 }
 0x181   :  { %v2362_v48 = vadd.f32 %v692_v29, %v668_v28  ;;  %v431_v30 = vsel %vm424_vm1, %v2360_v31, 0.0  ;;  %v2459_v29 = vld [vmem:[%s3212_s1 + $0x8] sm:$0xff] }
 0x182   :  { %432 = vadd.xlane.f32.xlu2 %v431_v30  ;;  %v2464_v30 = vld [vmem:[%s3213_s2 + $0x8] sm:$0xff]  ;;  %v662_v2 = vmul.f32 %v2316_v17, %v2459_v29  ;;  %v2480_v17 = vld [vmem:[%s3213_s2] sm:$0xff] }
 0x183   :  { %714 = vmatpush.xpose.msra.mxu3 %v2362_v48 }
 0x18e   :  { %v680_v26 = vpop.permute.xlu1 %679 }
 0x18f   :  { %v690_v15 = vmul.f32 %v680_v26, %v2386_v0 }
 0x191   :  { %v2407_v59 = vadd.f32 %v690_v15, %v666_v45 }
 0x196   :  { %v678_v33 = vpop.permute.xlu1 %677 }
 0x197   :  { %v689_v50 = vmul.f32 %v678_v33, %v2404_v7 }
 0x199   :  { %v2421_v60 = vadd.f32 %v689_v50, %v665_v63 }
 0x1a9   :  { %v294_v37 = vpop.permute.xlu0 %293 }
 0x1aa   :  { %v302_v38 = vmul.f32 %v294_v37, %v2355_v58 }
 0x1ac   :  { %v310_v39 = vadd.f32 %v302_v38, %v278_v35  ;;  %v273_v38 = vmul.f32 %v2319_v5, %v2448_v12 }
 0x1ae   :  { %324 = vmatpush.xpose.msra.mxu0 %v310_v39  ;;  %372 = vmatpush.msra.mxu1 %v310_v39  ;;  %v2475_v39 = vld [vmem:[%s3212_s1] sm:$0xff] }
 0x1af   :  { %v661_v5 = vmul.f32 %v2333_v6, %v2475_v39  ;;  %v2494_v6 = vld [vmem:[%s3214_s5] sm:$0xff] }
 0x1b0   :  { %373 = vmatpush.msra.mxu1 %v309_v47 }
 0x1b1   :  { %v682_v43 = vpop.permute.xlu0 %681 }
 0x1b2   :  { %v691_v56 = vmul.f32 %v682_v43, %v2370_v16  ;;  %325 = vmatpush.xpose.msra.mxu0 %v309_v47 }
 0x1b4   :  { %v2392_v34 = vadd.f32 %v691_v56, %v667_v44  ;;  %v272_v56 = vmul.f32 %v2330_v14, %v2459_v29 }
 0x1b6   :  { %715 = vmatpush.xpose.msra.mxu3 %v2392_v34 }
 0x1b9   :  { %v290_v10 = vpop.permute.xlu0 %289 }
 0x1ba   :  { %v300_v42 = vmul.f32 %v290_v10, %v2386_v0  ;;  %716 = vmatpush.xpose.msra.mxu3 %v2407_v59  ;;  %v271_v10 = vmul.f32 %v2342_v21, %v2475_v39 }
 0x1bc   :  { %v308_v18 = vadd.f32 %v300_v42, %v276_v41 }
 0x1be   :  { %326 = vmatpush.xpose.msra.mxu0 %v308_v18  ;;  %374 = vmatpush.msra.mxu1 %v308_v18 }
 0x1bf   :  { %717 = vmatpush.xpose.msra.mxu3 %v2421_v60 }
 0x1c1   :  { %v288_v4 = vpop.permute.xlu0 %287  ;;  %v676_v8 = vpop.permute.xlu1 %675 }
 0x1c2   :  { %v299_v55 = vmul.f32 %v288_v4, %v2404_v7  ;;  %v688_v13 = vmul.f32 %v676_v8, %v2427_v3 }
 0x1c4   :  { %v696_v46 = vadd.f32 %v688_v13, %v664_v49  ;;  %v307_v53 = vadd.f32 %v299_v55, %v275_v32 }
 0x1c6   :  { %327 = vmatpush.xpose.msra.mxu0 %v307_v53  ;;  %375 = vmatpush.msra.mxu1 %v307_v53 }
 0x1c7   :  { %718 = vmatpush.xpose.msra.mxu3 %v696_v46 }
 0x1c9   :  { %v286_v22 = vpop.permute.xlu0 %285  ;;  %v674_v52 = vpop.permute.xlu1 %673 }
 0x1ca   :  { %v298_v23 = vmul.f32 %v286_v22, %v2427_v3  ;;  %v687_v1 = vmul.f32 %v674_v52, %v2443_v61 }
 0x1cc   :  { %v695_v62 = vadd.f32 %v687_v1, %v663_v36  ;;  %v306_v28 = vadd.f32 %v298_v23, %v274_v24  ;;  %v2513_v1 = vld [vmem:[%s3206_s0 + $0xa8] sm:$0xff] }
 0x1ce   :  { %328 = vmatpush.xpose.msra.mxu0 %v306_v28  ;;  %376 = vmatpush.msra.mxu1 %v306_v28 }
 0x1cf   :  { %719 = vmatpush.xpose.msra.mxu3 %v695_v62 }
 0x1d1   :  { %v672_v51 = vpop.permute.xlu1 %671  ;;  %v284_v11 = vpop.permute.xlu0 %283 }
 0x1d2   :  { %v686_v37 = vmul.f32 %v672_v51, %v2464_v30  ;;  %v297_v27 = vmul.f32 %v284_v11, %v2443_v61  ;;  %v2519_v51 = vld [vmem:[%s3206_s0 + $0x90] sm:$0xff] }
 0x1d4   :  { %v694_v35 = vadd.f32 %v686_v37, %v662_v2  ;;  %v305_v26 = vadd.f32 %v297_v27, %v273_v38  ;;  %v1665_v37 = vld [vmem:[%s3206_s0 + $0xc8] sm:$0xff]  ;;  %v2532_v27 = vld [vmem:[%s3206_s0 + $0x98] sm:$0xff]  ;;  %v1664_v38 = vld [vmem:[%s3206_s0 + $0xc0] sm:$0xff] }
 0x1d6   :  { %329 = vmatpush.xpose.msra.mxu0 %v305_v26  ;;  %377 = vmatpush.msra.mxu1 %v305_v26  ;;  %v2547_v26 = vld [vmem:[%s3206_s0 + $0xb0] sm:$0xff] }
 0x1d7   :  { %720 = vmatpush.xpose.msra.mxu3 %v694_v35 }
 0x1d9   :  { %v282_v54 = vpop.permute.xlu0 %281  ;;  %v670_v47 = vpop.permute.xlu1 %669 }
 0x1da   :  { %v296_v43 = vmul.f32 %v282_v54, %v2464_v30  ;;  %v685_v44 = vmul.f32 %v670_v47, %v2480_v17  ;;  %v2553_v54 = vld [vmem:[%s3206_s0 + $0xa0] sm:$0xff] }
 0x1dc   :  { %v693_v15 = vadd.f32 %v685_v44, %v661_v5  ;;  %v304_v45 = vadd.f32 %v296_v43, %v272_v56 }
 0x1de   :  { %330 = vmatpush.xpose.msra.mxu0 %v304_v45  ;;  %378 = vmatpush.msra.mxu1 %v304_v45 }
 0x1df   :  { %721 = vmatpush.xpose.msra.mxu3 %v693_v15 }
 0x1e1   :  { %v280_v33 = vpop.permute.xlu0 %279 }
 0x1e2   :  { %v295_v50 = vmul.f32 %v280_v33, %v2480_v17 }
 0x1e4   :  { %v303_v42 = vadd.f32 %v295_v50, %v271_v10 }
 0x1e6   :  { %331 = vmatpush.xpose.msra.mxu0 %v303_v42  ;;  %379 = vmatpush.msra.mxu1 %v303_v42 }
 0x1e8   :  { %761 = vmatpush.msrb.mxu1 %v2362_v48 }
 0x1e9   :  { %332 = vmatmul.f32.vlgmr.msra.gmra.mxu0 %v2494_v6 }
 0x1ea   :  { %762 = vmatpush.msrb.mxu1 %v2392_v34 }
 0x1ec   :  { %763 = vmatpush.msrb.mxu1 %v2407_v59 }
 0x1ee   :  { %764 = vmatpush.msrb.mxu1 %v2421_v60 }
 0x1f0   :  { %765 = vmatpush.msrb.mxu1 %v696_v46 }
 0x1f2   :  { %766 = vmatpush.msrb.mxu1 %v695_v62 }
 0x1f4   :  { %767 = vmatpush.msrb.mxu1 %v694_v35  ;;  %v2541_v35 = vld [vmem:[%s3206_s0 + $0xb8] sm:$0xff] }
 0x1f5   :  { %v433_v14 = vpop.xlane.xlu2 %432 }
 0x1f6   :  { %768 = vmatpush.msrb.mxu1 %v693_v15  ;;  %1724 = vrcp.f32 %v433_v14  ;;  %v445_v18 = vand.u32 2147483648, %v433_v14  ;;  %v443_v48 = vand.u32 2147483647, %v433_v14  ;;  %vm439_vm6 = vweird.f32 %v433_v14 }
 0x1f8   :  { %v446_v34 = vor.u32 1.1754944e-38, %v445_v18  ;;  %vm444_vm8 = vcmp.eq.f32.partialorder %v443_v48, 8.507059e+37 }
 0x1fc   :  { %v1725_v21 = vpop.eup %1724 }
 0x1fd   :  { %v435_v41 = vmul.f32 %v1725_v21, %v433_v14  ;;  %vm440_vm5 = vweird.f32 %v1725_v21 }
 0x1fe   :  { %vm441_vm7 = vmor %vm439_vm6, %vm440_vm5 }
 0x1ff   :  { %v436_v63 = vsub.f32 1.0, %v435_v41 }
 0x201   :  { %v437_v4 = vmul.f32 %v1725_v21, %v436_v63 }
 0x203   :  { %v438_v8 = vadd.f32 %v1725_v21, %v437_v4 }
 0x205   :  { %v442_v59 = vsel %vm441_vm7, %v1725_v21, %v438_v8 }
 0x206   :  { %v447_v60 = vsel %vm444_vm8, %v446_v34, %v442_v59 }
 0x207   :  { %v448_v55 = vmul.f32 %v2360_v31, %v447_v60 }
 0x209   :  { %1644 = vmatmul.msk.f32.vlgmr.msrb.gmra.mxu3 %vm449_vm9, %v448_v55 }
 0x211   :  { %722 = vmatmul.f32.vlgmr.msra.gmra.mxu3 %v2494_v6 }
 0x266   :  { %v333_v49 = vpop.f32.mrf.mxu0 }
 0x267   :  { %v337_v13 = vsel %vm336_vm10, %v333_v49, -inf }
 0x268   :  { %338 = vmax.xlane.f32.xlu2 %v337_v13 }
 0x28c   :  { %v470_v32 = vpop.f32.mrf.mxu3 }
 0x28d   :  { %474 = vst [vmem:[%s3215_s10 + $0x8] sm:$0x1] %v470_v32 }
 0x294   :  { %v723_v46 = vpop.f32.mrf.mxu3 }
 0x295   :  { %v726_v53 = vsel %vm336_vm10, %v723_v46, -inf }
 0x296   :  { %727 = vmax.xlane.f32.xlu0 %v726_v53  ;;  %v2570_v53 = vld [vmem:[%s3216_s9 + $0x70] sm:$0xff] }
 0x29e   :  { %879 = vadd.xlane.f32.xlu0 %v2513_v1 }
 0x2a6   :  { %873 = vadd.xlane.f32.xlu0 %v2519_v51 }
 0x2db   :  { %v339_v22 = vpop.xlane.xlu2 %338 }
 0x2dc   :  { %v340_v31 = vsub.f32 %v333_v49, %v339_v22 }
 0x2de   :  { %v341_v52 = vmul.f32 1.442695, %v340_v31 }
 0x2e0   :  { %1726 = vpow2.f32 %v341_v52 }
 0x2e6   :  { %v1727_v23 = vpop.eup %1726 }
 0x2e7   :  { %v343_v36 = vsel %vm336_vm10, %v1727_v23, 0.0 }
 0x2e8   :  { %344 = vadd.xlane.f32.xlu1 %v343_v36  ;;  %v2578_v36 = vld [vmem:[%s3216_s9 + $0x68] sm:$0xff] }
 0x2f0   :  { %875 = vadd.xlane.f32.xlu1 %v2532_v27 }
 0x309   :  { %v728_v24 = vpop.xlane.xlu0 %727 }
 0x30a   :  { %v729_v62 = vsub.f32 %v723_v46, %v728_v24  ;;  %v2565_v46 = vld [vmem:[%s3216_s9 + $0x78] sm:$0xff] }
 0x30b   :  { %384 = vmatpush.msra.mxu2 %v2565_v46  ;;  %773 = vmatpush.msrb.mxu0 %v2565_v46 }
 0x30c   :  { %v730_v28 = vmul.f32 1.442695, %v729_v62  ;;  %1161 = vmatpush.msrb.mxu3 %v2565_v46 }
 0x30d   :  { %385 = vmatpush.msra.mxu2 %v2570_v53  ;;  %774 = vmatpush.msrb.mxu0 %v2570_v53 }
 0x30e   :  { %1728 = vpow2.f32 %v730_v28  ;;  %1162 = vmatpush.msrb.mxu3 %v2570_v53 }
 0x30f   :  { %386 = vmatpush.msra.mxu2 %v2578_v36  ;;  %775 = vmatpush.msrb.mxu0 %v2578_v36 }
 0x310   :  { %1163 = vmatpush.msrb.mxu3 %v2578_v36 }
 0x311   :  { %v880_v13 = vpop.xlane.xlu0 %879 }
 0x312   :  { %v892_v28 = vmul.f32 %v880_v13, %v1962_v25  ;;  %v2706_v13 = vld [vmem:[%s3216_s9 + $0x8] sm:$0xff] }
 0x313   :  { %3238 = vst [vmem:[#allocation4_spill] sm:$0xff] %v2706_v13 }
 0x314   :  { %v2522_v11 = vpop.eup %1728 }
 0x315   :  { %v732_v2 = vsel %vm336_vm10, %v2522_v11, 0.0 }
 0x316   :  { %733 = vadd.xlane.f32.xlu2 %v732_v2  ;;  %v2590_v2 = vld [vmem:[%s3216_s9 + $0x60] sm:$0xff] }
 0x317   :  { %387 = vmatpush.msra.mxu2 %v2590_v2  ;;  %776 = vmatpush.msrb.mxu0 %v2590_v2 }
 0x318   :  { %1164 = vmatpush.msrb.mxu3 %v2590_v2 }
 0x31e   :  { %887 = vadd.xlane.f32.xlu2 %v1665_v37 }
 0x326   :  { %885 = vadd.xlane.f32.xlu2 %v1664_v38 }
 0x32e   :  { %883 = vadd.xlane.f32.xlu2 %v2541_v35 }
 0x336   :  { %881 = vadd.xlane.f32.xlu2 %v2547_v26 }
 0x33e   :  { %877 = vadd.xlane.f32.xlu2 %v2553_v54 }
 0x35b   :  { %v345_v47 = vpop.xlane.xlu1 %344 }
 0x35c   :  { %1730 = vrcp.f32 %v345_v47  ;;  %v357_v56 = vand.u32 2147483648, %v345_v47  ;;  %v355_v45 = vand.u32 2147483647, %v345_v47  ;;  %vm351_vm12 = vweird.f32 %v345_v47 }
 0x35e   :  { %v358_v50 = vor.u32 1.1754944e-38, %v357_v56  ;;  %vm356_vm14 = vcmp.eq.f32.partialorder %v355_v45, 8.507059e+37 }
 0x362   :  { %v1731_v43 = vpop.eup %1730 }
 0x363   :  { %v347_v5 = vmul.f32 %v1731_v43, %v345_v47  ;;  %vm352_vm11 = vweird.f32 %v1731_v43  ;;  %v2611_v47 = vld [vmem:[%s3216_s9 + $0x50] sm:$0xff] }
 0x364   :  { %vm353_vm13 = vmor %vm351_vm12, %vm352_vm11 }
 0x365   :  { %v348_v44 = vsub.f32 1.0, %v347_v5  ;;  %v874_v5 = vpop.xlane.xlu0 %873 }
 0x366   :  { %v889_v45 = vmul.f32 %v874_v5, %v1962_v25 }
 0x367   :  { %v349_v15 = vmul.f32 %v1731_v43, %v348_v44 }
 0x369   :  { %v350_v33 = vadd.f32 %v1731_v43, %v349_v15 }
 0x36b   :  { %v354_v10 = vsel %vm353_vm13, %v1731_v43, %v350_v33  ;;  %v2634_v33 = vld [vmem:[%s3216_s9 + $0x40] sm:$0xff] }
 0x36c   :  { %v359_v42 = vsel %vm356_vm14, %v358_v50, %v354_v10  ;;  %v2644_v50 = vld [vmem:[%s3216_s9 + $0x38] sm:$0xff]  ;;  %v2650_v10 = vsub.f32 %v2519_v51, %v889_v45 }
 0x36d   :  { %v360_v14 = vmul.f32 %v1727_v23, %v359_v42  ;;  %v2655_v42 = vld [vmem:[%s3216_s9 + $0x30] sm:$0xff] }
 0x36f   :  { %1643 = vmatmul.msk.f32.vlgmr.msra.gmra.mxu1 %vm336_vm10, %v360_v14 }
 0x389   :  { %v734_v21 = vpop.xlane.xlu2 %733 }
 0x38a   :  { %1732 = vrcp.f32 %v734_v21  ;;  %v746_v8 = vand.u32 2147483648, %v734_v21  ;;  %v744_v60 = vand.u32 2147483647, %v734_v21  ;;  %vm740_vm0 = vweird.f32 %v734_v21 }
 0x38c   :  { %v747_v32 = vor.u32 1.1754944e-38, %v746_v8  ;;  %vm745_vm3 = vcmp.eq.f32.partialorder %v744_v60, 8.507059e+37  ;;  %v2687_v8 = vld [vmem:[%s3216_s9 + $0x18] sm:$0xff]  ;;  %v2698_v60 = vld [vmem:[%s3216_s9 + $0x10] sm:$0xff] }
 0x38d   :  { %3237 = vst [vmem:[#allocation3_spill] sm:$0xff] %v2698_v60 }
 0x390   :  { %v1733_v41 = vpop.eup %1732 }
 0x391   :  { %v736_v63 = vmul.f32 %v1733_v41, %v734_v21  ;;  %v888_v18 = vpop.xlane.xlu2 %887  ;;  %vm741_vm15 = vweird.f32 %v1733_v41  ;;  %v876_v21 = vpop.xlane.xlu1 %875 }
 0x392   :  { %v896_v4 = vmul.f32 %v888_v18, %v1962_v25  ;;  %vm742_vm2 = vmor %vm740_vm0, %vm741_vm15  ;;  %v905_v18 = vmul.f32 %v2650_v10, %v2650_v10 }
 0x393   :  { %v737_v48 = vsub.f32 1.0, %v736_v63  ;;  %v2663_v63 = vld [vmem:[%s3216_s9 + $0x28] sm:$0xff] }
 0x394   :  { %v2558_v34 = vsub.f32 %v1665_v37, %v896_v4  ;;  %v2600_v37 = vld [vmem:[%s3216_s9 + $0x58] sm:$0xff]  ;;  %v890_v4 = vmul.f32 %v876_v21, %v1962_v25 }
 0x395   :  { %v738_v59 = vmul.f32 %v1733_v41, %v737_v48  ;;  %388 = vmatpush.msra.mxu2 %v2600_v37  ;;  %777 = vmatpush.msrb.mxu0 %v2600_v37  ;;  %v2677_v48 = vld [vmem:[%s3216_s9 + $0x20] sm:$0xff] }
 0x396   :  { %v912_v55 = vmul.f32 %v2558_v34, %v2558_v34  ;;  %1165 = vmatpush.msrb.mxu3 %v2600_v37 }
 0x397   :  { %v739_v49 = vadd.f32 %v1733_v41, %v738_v59  ;;  %389 = vmatpush.msra.mxu2 %v2611_v47  ;;  %778 = vmatpush.msrb.mxu0 %v2611_v47  ;;  %v2693_v59 = vsub.f32 %v2532_v27, %v890_v4 }
 0x398   :  { %927 = vadd.xlane.f32.xlu2 %v912_v55  ;;  %1166 = vmatpush.msrb.mxu3 %v2611_v47 }
 0x399   :  { %v886_v22 = vpop.xlane.xlu2 %885  ;;  %v743_v31 = vsel %vm742_vm2, %v1733_v41, %v739_v49 }
 0x39a   :  { %v895_v52 = vmul.f32 %v886_v22, %v1962_v25  ;;  %v748_v23 = vsel %vm745_vm3, %v747_v32, %v743_v31  ;;  %v906_v32 = vmul.f32 %v2693_v59, %v2693_v59 }
 0x39b   :  { %v749_v24 = vmul.f32 %v2522_v11, %v748_v23 }
 0x39c   :  { %v2584_v62 = vsub.f32 %v1664_v38, %v895_v52  ;;  %v2606_v38 = vsub.f32 %v2513_v1, %v892_v28  ;;  %v2620_v1 = vld [vmem:[%s3216_s9 + $0x48] sm:$0xff] }
 0x39d   :  { %1654 = vmatmul.msk.f32.vlgmr.msrb.gmra.mxu1 %vm336_vm10, %v749_v24  ;;  %390 = vmatpush.msra.mxu2 %v2620_v1 }
 0x39e   :  { %v911_v11 = vmul.f32 %v2584_v62, %v2584_v62  ;;  %v908_v15 = vmul.f32 %v2606_v38, %v2606_v38  ;;  %779 = vmatpush.msrb.mxu0 %v2620_v1  ;;  %1167 = vmatpush.msrb.mxu3 %v2620_v1 }
 0x39f   :  { %391 = vmatpush.msra.mxu2 %v2634_v33 }
 0x3a0   :  { %925 = vadd.xlane.f32.xlu1 %v911_v11  ;;  %780 = vmatpush.msrb.mxu0 %v2634_v33 }
 0x3a1   :  { %v884_v43 = vpop.xlane.xlu2 %883  ;;  %392 = vmatpush.msra.mxu2 %v2644_v50  ;;  %1168 = vmatpush.msrb.mxu3 %v2634_v33 }
 0x3a2   :  { %v894_v44 = vmul.f32 %v884_v43, %v1962_v25  ;;  %781 = vmatpush.msrb.mxu0 %v2644_v50 }
 0x3a3   :  { %393 = vmatpush.msra.mxu2 %v2655_v42  ;;  %1169 = vmatpush.msrb.mxu3 %v2644_v50 }
 0x3a4   :  { %v2626_v56 = vsub.f32 %v2541_v35, %v894_v44  ;;  %782 = vmatpush.msrb.mxu0 %v2655_v42 }
 0x3a5   :  { %394 = vmatpush.msra.mxu2 %v2663_v63  ;;  %1170 = vmatpush.msrb.mxu3 %v2655_v42 }
 0x3a6   :  { %v910_v35 = vmul.f32 %v2626_v56, %v2626_v56  ;;  %783 = vmatpush.msrb.mxu0 %v2663_v63 }
 0x3a7   :  { %395 = vmatpush.msra.mxu2 %v2677_v48  ;;  %1171 = vmatpush.msrb.mxu3 %v2663_v63 }
 0x3a8   :  { %919 = vadd.xlane.f32.xlu1 %v908_v15  ;;  %923 = vadd.xlane.f32.xlu0 %v910_v35 }
 0x3a9   :  { %v882_v14 = vpop.xlane.xlu2 %881  ;;  %396 = vmatpush.msra.mxu2 %v2687_v8  ;;  %784 = vmatpush.msrb.mxu0 %v2677_v48 }
 0x3aa   :  { %v893_v41 = vmul.f32 %v882_v14, %v1962_v25  ;;  %1172 = vmatpush.msrb.mxu3 %v2677_v48 }
 0x3ab   :  { %397 = vmatpush.msra.mxu2 %v2698_v60  ;;  %785 = vmatpush.msrb.mxu0 %v2687_v8 }
 0x3ac   :  { %v2669_v51 = vsub.f32 %v2547_v26, %v893_v41  ;;  %1173 = vmatpush.msrb.mxu3 %v2687_v8 }
 0x3ad   :  { %398 = vmatpush.msra.mxu2 %v2706_v13  ;;  %786 = vmatpush.msrb.mxu0 %v2698_v60 }
 0x3ae   :  { %v909_v26 = vmul.f32 %v2669_v51, %v2669_v51  ;;  %1174 = vmatpush.msrb.mxu3 %v2698_v60 }
 0x3af   :  { %787 = vmatpush.msrb.mxu0 %v2706_v13 }
 0x3b0   :  { %913 = vadd.xlane.f32.xlu1 %v905_v18  ;;  %921 = vadd.xlane.f32.xlu2 %v909_v26 }
 0x3b1   :  { %v878_v55 = vpop.xlane.xlu2 %877  ;;  %1175 = vmatpush.msrb.mxu3 %v2706_v13 }
 0x3b2   :  { %v891_v49 = vmul.f32 %v878_v55, %v1962_v25 }
 0x3b4   :  { %v2712_v27 = vsub.f32 %v2553_v54, %v891_v49  ;;  %v2728_v54 = vld [vmem:[%s3216_s9] sm:$0xff] }
 0x3b5   :  { %3239 = vst [vmem:[#allocation5_spill] sm:$0xff] %v2728_v54  ;;  %399 = vmatpush.msra.mxu2 %v2728_v54  ;;  %788 = vmatpush.msrb.mxu0 %v2728_v54 }
 0x3b6   :  { %v907_v22 = vmul.f32 %v2712_v27, %v2712_v27  ;;  %1176 = vmatpush.msrb.mxu3 %v2728_v54 }
 0x3b8   :  { %915 = vadd.xlane.f32.xlu2 %v906_v32  ;;  %917 = vadd.xlane.f32.xlu0 %v907_v22 }
 0x3ec   :  { %v381_v31 = vpop.f32.mrf.mxu1 }
 0x3ed   :  { %400 = vmatmul.f32.vlgmr.msra.gmra.mxu2 %v381_v31 }
 0x40b   :  { %v928_v52 = vpop.xlane.xlu2 %927 }
 0x40c   :  { %v936_v23 = vmul.f32 %v928_v52, %v1962_v25 }
 0x40e   :  { %v944_v24 = vadd.f32 1e-05, %v936_v23 }
 0x410   :  { %1734 = vrsqrt.f32 %v944_v24  ;;  %vm1021_vm5 = vweird.f32 %v944_v24 }
 0x413   :  { %v926_v28 = vpop.xlane.xlu1 %925 }
 0x414   :  { %v935_v11 = vmul.f32 %v926_v28, %v1962_v25 }
 0x416   :  { %v1735_v43 = vpop.eup %1734  ;;  %v943_v5 = vadd.f32 1e-05, %v935_v11 }
 0x417   :  { %v1016_v44 = vmul.f32 %v1735_v43, %v944_v24  ;;  %vm1022_vm4 = vweird.f32 %v1735_v43  ;;  %v2746_v24 = vld [vmem:[%s3210_s7] ss:$0 sm:$0xff] }
 0x418   :  { %1736 = vrsqrt.f32 %v943_v5  ;;  %vm1023_vm6 = vmor %vm1021_vm5, %vm1022_vm4  ;;  %vm1011_vm8 = vweird.f32 %v943_v5 }
 0x419   :  { %v1017_v15 = vmul.f32 %v1735_v43, %v1016_v44 }
 0x41a   :  { %v770_v45 = vpop.f32.mrf.mxu1 }
 0x41b   :  { %v1018_v35 = vmul.f32 0.5, %v1017_v15  ;;  %789 = vmatmul.f32.vlgmr.msrb.gmra.mxu0 %v770_v45  ;;  %v920_v14 = vpop.xlane.xlu1 %919  ;;  %v924_v21 = vpop.xlane.xlu0 %923 }
 0x41c   :  { %v932_v41 = vmul.f32 %v920_v14, %v1962_v25  ;;  %v934_v18 = vmul.f32 %v924_v21, %v1962_v25 }
 0x41d   :  { %v1019_v4 = vsub.f32 1.5, %v1018_v35 }
 0x41e   :  { %v1737_v26 = vpop.eup %1736  ;;  %v940_v55 = vadd.f32 1e-05, %v932_v41  ;;  %v2737_v49 = vadd.f32 1e-05, %v934_v18  ;;  %v2756_v41 = vld [vmem:[%s3211_s8] ss:$0 sm:$0xff] }
 0x41f   :  { %v1020_v32 = vmul.f32 %v1735_v43, %v1019_v4  ;;  %v1006_v22 = vmul.f32 %v1737_v26, %v943_v5  ;;  %vm1012_vm7 = vweird.f32 %v1737_v26 }
 0x420   :  { %1738 = vrsqrt.f32 %v940_v55  ;;  %vm1013_vm11 = vmor %vm1011_vm8, %vm1012_vm7  ;;  %vm981_vm12 = vweird.f32 %v940_v55  ;;  %vm1001_vm0 = vweird.f32 %v2737_v49 }
 0x421   :  { %v1024_v31 = vsel %vm1023_vm6, %v1735_v43, %v1020_v32  ;;  %v1007_v52 = vmul.f32 %v1737_v26, %v1006_v22  ;;  %1740 = vrsqrt.f32 %v2737_v49 }
 0x422   :  { %v1032_v23 = vmul.f32 %v1024_v31, %v2558_v34 }
 0x423   :  { %v1008_v28 = vmul.f32 0.5, %v1007_v52  ;;  %v914_v11 = vpop.xlane.xlu1 %913  ;;  %v922_v44 = vpop.xlane.xlu2 %921 }
 0x424   :  { %v929_v15 = vmul.f32 %v914_v11, %v1962_v25  ;;  %v933_v45 = vmul.f32 %v922_v44, %v1962_v25  ;;  %v1040_v35 = vmul.f32 %v2746_v24, %v1032_v23 }
 0x425   :  { %v1009_v43 = vsub.f32 1.5, %v1008_v28 }
 0x426   :  { %v1739_v14 = vpop.eup %1738  ;;  %v2749_v21 = vadd.f32 1e-05, %v929_v15  ;;  %v2751_v34 = vadd.f32 1e-05, %v933_v45  ;;  %v2759_v18 = vadd.f32 %v2756_v41, %v1040_v35 }
 0x427   :  { %v1741_v4 = vpop.eup %1740  ;;  %v1010_v32 = vmul.f32 %v1737_v26, %v1009_v43  ;;  %v976_v22 = vmul.f32 %v1739_v14, %v940_v55  ;;  %vm982_vm13 = vweird.f32 %v1739_v14 }
 0x428   :  { %v996_v31 = vmul.f32 %v1741_v4, %v2737_v49  ;;  %1742 = vrsqrt.f32 %v2749_v21  ;;  %1071 = vrot.lane.b32.xlu0 %v2759_v18, %s1808_s19  ;;  %vm1002_vm14 = vweird.f32 %v1741_v4  ;;  %vm2772_vm15 = vmor %vm981_vm12, %vm982_vm13  ;;  %vm991_vm4 = vweird.f32 %v2751_v34 }
 0x429   :  { %v1014_v52 = vsel %vm1013_vm11, %v1737_v26, %v1010_v32  ;;  %v977_v23 = vmul.f32 %v1739_v14, %v976_v22  ;;  %1744 = vrsqrt.f32 %v2751_v34  ;;  %vm1003_vm2 = vmor %vm1001_vm0, %vm1002_vm14  ;;  %vm951_vm11 = vweird.f32 %v2749_v21 }
 0x42a   :  { %v997_v28 = vmul.f32 %v1741_v4, %v996_v31  ;;  %v1031_v11 = vmul.f32 %v1014_v52, %v2584_v62 }
 0x42b   :  { %v978_v44 = vmul.f32 0.5, %v977_v23  ;;  %v918_v5 = vpop.xlane.xlu0 %917  ;;  %v916_v15 = vpop.xlane.xlu2 %915 }
 0x42c   :  { %v998_v45 = vmul.f32 0.5, %v997_v28  ;;  %v931_v35 = vmul.f32 %v918_v5, %v1962_v25  ;;  %v930_v43 = vmul.f32 %v916_v15, %v1962_v25  ;;  %v1039_v54 = vmul.f32 %v2746_v24, %v1031_v11 }
 0x42d   :  { %v979_v13 = vsub.f32 1.5, %v978_v44 }
 0x42e   :  { %v2770_v26 = vpop.eup %1742  ;;  %v999_v62 = vsub.f32 1.5, %v998_v45  ;;  %v939_v55 = vadd.f32 1e-05, %v931_v35  ;;  %v938_v22 = vadd.f32 1e-05, %v930_v43  ;;  %v2777_v31 = vadd.f32 %v2756_v41, %v1039_v54 }
 0x42f   :  { %v1745_v52 = vpop.eup %1744  ;;  %v980_v23 = vmul.f32 %v1739_v14, %v979_v13  ;;  %v946_v11 = vmul.f32 %v2770_v26, %v2749_v21  ;;  %vm952_vm12 = vweird.f32 %v2770_v26 }
 0x430   :  { %v1000_v28 = vmul.f32 %v1741_v4, %v999_v62  ;;  %v986_v44 = vmul.f32 %v1745_v52, %v2751_v34  ;;  %1746 = vrsqrt.f32 %v939_v55  ;;  %1069 = vrot.lane.b32.xlu2 %v2777_v31, %s1808_s19  ;;  %vm992_vm3 = vweird.f32 %v1745_v52  ;;  %vm953_vm0 = vmor %vm951_vm11, %vm952_vm12 }
 0x431   :  { %v984_v5 = vsel %vm2772_vm15, %v1739_v14, %v980_v23  ;;  %1748 = vrsqrt.f32 %v938_v22  ;;  %v947_v45 = vmul.f32 %v2770_v26, %v946_v11  ;;  %vm993_vm5 = vmor %vm991_vm4, %vm992_vm3  ;;  %vm961_vm6 = vweird.f32 %v938_v22 }
 0x432   :  { %v1004_v54 = vsel %vm1003_vm2, %v1741_v4, %v1000_v28  ;;  %v987_v13 = vmul.f32 %v1745_v52, %v986_v44  ;;  %v1028_v49 = vmul.f32 %v984_v5, %v2606_v38  ;;  %vm971_vm13 = vweird.f32 %v939_v55 }
 0x433   :  { %v1030_v15 = vmul.f32 %v1004_v54, %v2626_v56  ;;  %v948_v38 = vmul.f32 0.5, %v947_v45 }
 0x434   :  { %v988_v35 = vmul.f32 0.5, %v987_v13  ;;  %v1036_v43 = vmul.f32 %v2746_v24, %v1028_v49 }
 0x435   :  { %v1038_v62 = vmul.f32 %v2746_v24, %v1030_v15  ;;  %v949_v49 = vsub.f32 1.5, %v948_v38 }
 0x436   :  { %v1747_v25 = vpop.eup %1746  ;;  %v989_v60 = vsub.f32 1.5, %v988_v35  ;;  %v2794_v14 = vadd.f32 %v2756_v41, %v1036_v43 }
 0x437   :  { %v1749_v32 = vpop.eup %1748  ;;  %v966_v4 = vmul.f32 %v1747_v25, %v939_v55  ;;  %v2797_v23 = vadd.f32 %v2756_v41, %v1038_v62  ;;  %vm972_vm8 = vweird.f32 %v1747_v25 }
 0x438   :  { %v990_v56 = vmul.f32 %v1745_v52, %v989_v60  ;;  %v956_v28 = vmul.f32 %v1749_v32, %v938_v22  ;;  %1063 = vrot.lane.b32.xlu2 %v2794_v14, %s1808_s19  ;;  %vm962_vm7 = vweird.f32 %v1749_v32  ;;  %vm973_vm15 = vmor %vm971_vm13, %vm972_vm8 }
 0x439   :  { %v967_v11 = vmul.f32 %v1747_v25, %v966_v4  ;;  %1067 = vrot.lane.b32.xlu1 %v2797_v23, %s1808_s19  ;;  %vm963_vm14 = vmor %vm961_vm6, %vm962_vm7 }
 0x43a   :  { %v994_v44 = vsel %vm993_vm5, %v1745_v52, %v990_v56  ;;  %v957_v5 = vmul.f32 %v1749_v32, %v956_v28 }
 0x43b   :  { %v968_v54 = vmul.f32 0.5, %v967_v11  ;;  %v1029_v13 = vmul.f32 %v994_v44, %v2669_v51  ;;  %v950_v51 = vmul.f32 %v2770_v26, %v949_v49  ;;  %v1653_v11 = vld [vmem:[%s3206_s0 + $0x88] sm:$0xff]  ;;  %v2846_v44 = vld [vmem:[%s3206_s0 + $0xf8] sm:$0xff] }
 0x43c   :  { %v958_v15 = vmul.f32 0.5, %v957_v5  ;;  %v2852_v5 = vld [vmem:[%s3206_s0 + $0xe0] sm:$0xff] }
 0x43d   :  { %v969_v60 = vsub.f32 1.5, %v968_v54  ;;  %v1037_v34 = vmul.f32 %v2746_v24, %v1029_v13  ;;  %v954_v38 = vsel %vm953_vm0, %v2770_v26, %v950_v51  ;;  %v2837_v26 = vld [vmem:[%s3206_s0 + $0x110] sm:$0xff] }
 0x43e   :  { %v959_v45 = vsub.f32 1.5, %v958_v15  ;;  %v1056_v15 = vmul.f32 %v2759_v18, %v2350_v9  ;;  %v2870_v9 = vld [vmem:[%s3206_s0 + $0x108] sm:$0xff]  ;;  %v2884_v18 = vld [vmem:[%s3206_s0 + $0xf0] sm:$0xff] }
 0x43f   :  { %v970_v35 = vmul.f32 %v1747_v25, %v969_v60  ;;  %v1045_v52 = vadd.f32 %v2756_v41, %v1037_v34 }
 0x440   :  { %v960_v43 = vmul.f32 %v1749_v32, %v959_v45 }
 0x441   :  { %v974_v22 = vsel %vm973_vm15, %v1747_v25, %v970_v35  ;;  %1065 = vrot.lane.b32.xlu0 %v1045_v52, %s1808_s19  ;;  %v1055_v35 = vmul.f32 %v2777_v31, %v2375_v19 }
 0x442   :  { %v964_v62 = vsel %vm963_vm14, %v1749_v32, %v960_v43  ;;  %v1027_v4 = vmul.f32 %v974_v22, %v2712_v27  ;;  %v1025_v32 = vmul.f32 %v954_v38, %v2650_v10  ;;  %v1054_v22 = vmul.f32 %v2797_v23, %v2397_v40 }
 0x443   :  { %v1026_v21 = vmul.f32 %v964_v62, %v2693_v59  ;;  %v1052_v38 = vmul.f32 %v2794_v14, %v2432_v57  ;;  %v2907_v14 = vld [vmem:[%s3208_s4] sm:$0xff] }
 0x444   :  { %v1035_v55 = vmul.f32 %v2746_v24, %v1027_v4  ;;  %v1033_v59 = vmul.f32 %v2746_v24, %v1025_v32 }
 0x445   :  { %v1034_v56 = vmul.f32 %v2746_v24, %v1026_v21  ;;  %v2890_v21 = vld [vmem:[%s3206_s0 + $0xe8] sm:$0xff] }
 0x446   :  { %v1043_v28 = vadd.f32 %v2756_v41, %v1035_v55  ;;  %v2830_v27 = vadd.f32 %v2756_v41, %v1033_v59 }
 0x447   :  { %v2821_v25 = vadd.f32 %v2756_v41, %v1034_v56 }
 0x448   :  { %1061 = vrot.lane.b32.xlu1 %v1043_v28, %s1808_s19  ;;  %v1051_v55 = vmul.f32 %v1043_v28, %v2448_v12  ;;  %v2914_v12 = vld [vmem:[%s3206_s0 + $0xd8] sm:$0xff] }
 0x449   :  { %702 = vrot.lane.b32.xlu0 %v1653_v11, %s1808_s19  ;;  %1059 = vrot.lane.b32.xlu2 %v2821_v25, %s1808_s19 }
 0x451   :  { %1057 = vrot.lane.b32.xlu0 %v2830_v27, %s1808_s19 }
 0x470   :  { %v401_v10 = vpop.f32.mrf.mxu2 }
 0x471   :  { %473 = vst [vmem:[%s3215_s10] sm:$0xff] %v401_v10 }
 0x472   :  { %1275 = vadd.xlane.f32.xlu1 %v2837_v26  ;;  %1273 = vadd.xlane.f32.xlu2 %v2870_v9 }
 0x47a   :  { %1269 = vadd.xlane.f32.xlu1 %v2846_v44  ;;  %1267 = vadd.xlane.f32.xlu2 %v2884_v18 }
 0x482   :  { %1263 = vadd.xlane.f32.xlu1 %v2852_v5  ;;  %1261 = vadd.xlane.f32.xlu2 %v2914_v12 }
 0x48a   :  { %v1070_v13 = vpop.permute.xlu2 %1069 }
 0x48b   :  { %v1079_v34 = vmul.f32 %v1070_v13, %v2370_v16  ;;  %v2922_v13 = vld [vmem:[%s3209_s6] sm:$0x1] }
 0x48d   :  { %v1087_v51 = vadd.f32 %v1079_v34, %v1055_v35 }
 0x492   :  { %v1064_v16 = vpop.permute.xlu2 %1063 }
 0x493   :  { %v1076_v31 = vmul.f32 %v1064_v16, %v2427_v3 }
 0x495   :  { %v1084_v3 = vadd.f32 %v1076_v31, %v1052_v38 }
 0x498   :  { %v790_v54 = vpop.f32.mrf.mxu0 }
 0x499   :  { %1656 = vst [vmem:[%s3215_s10 + $0x10] sm:$0xff] %v790_v54 }
 0x49a   :  { %v1072_v49 = vpop.permute.xlu0 %1071 }
 0x49b   :  { %v1080_v60 = vmul.f32 %v1072_v49, %v2355_v58  ;;  %v2875_v58 = vld [vmem:[%s3206_s0 + $0x100] sm:$0xff]  ;;  %v1049_v49 = vmul.f32 %v2830_v27, %v2475_v39 }
 0x49c   :  { %1271 = vadd.xlane.f32.xlu0 %v2875_v58 }
 0x49d   :  { %v1088_v45 = vadd.f32 %v1080_v60, %v1056_v15 }
 0x49f   :  { %1102 = vmatpush.xpose.msra.mxu1 %v1088_v45 }
 0x4a3   :  { %1103 = vmatpush.xpose.msra.mxu1 %v1087_v51  ;;  %v1060_v57 = vpop.permute.xlu2 %1059 }
 0x4a4   :  { %1265 = vadd.xlane.f32.xlu0 %v2890_v21 }
 0x4ab   :  { %v1068_v43 = vpop.permute.xlu1 %1067 }
 0x4ac   :  { %v1078_v62 = vmul.f32 %v1068_v43, %v2386_v0  ;;  %v1053_v0 = vmul.f32 %v1045_v52, %v2412_v20 }
 0x4ae   :  { %v1086_v4 = vadd.f32 %v1078_v62, %v1054_v22 }
 0x4b0   :  { %1104 = vmatpush.xpose.msra.mxu1 %v1086_v4 }
 0x4b3   :  { %v1066_v19 = vpop.permute.xlu0 %1065 }
 0x4b4   :  { %v1077_v40 = vmul.f32 %v1066_v19, %v2404_v7  ;;  %v2899_v7 = vld [vmem:[%s3207_s3] sm:$0xff] }
 0x4b5   :  { %v701_v20 = vmul.f32 %v2899_v7, %v1653_v11  ;;  %v1074_v11 = vmul.f32 %v1060_v57, %v2464_v30 }
 0x4b6   :  { %v1085_v23 = vadd.f32 %v1077_v40, %v1053_v0 }
 0x4b8   :  { %1105 = vmatpush.xpose.msra.mxu1 %v1085_v23 }
 0x4ba   :  { %v1062_v52 = vpop.permute.xlu1 %1061 }
 0x4bb   :  { %v1075_v56 = vmul.f32 %v1062_v52, %v2443_v61  ;;  %v703_v32 = vpop.permute.xlu0 %702  ;;  %v1050_v61 = vmul.f32 %v2821_v25, %v2459_v29 }
 0x4bc   :  { %v704_v59 = vmul.f32 %v2907_v14, %v703_v32  ;;  %1106 = vmatpush.xpose.msra.mxu1 %v1084_v3 }
 0x4bd   :  { %v1083_v10 = vadd.f32 %v1075_v56, %v1051_v55  ;;  %v1082_v28 = vadd.f32 %v1074_v11, %v1050_v61 }
 0x4be   :  { %v705_v54 = vadd.f32 %v704_v59, %v701_v20 }
 0x4c0   :  { %808 = vmatpush.xpose.msra.mxu0 %v705_v54  ;;  %855 = vmatpush.msrb.mxu2 %v705_v54 }
 0x4c1   :  { %1107 = vmatpush.xpose.msra.mxu1 %v1083_v10 }
 0x4c2   :  { %1149 = vmatpush.msra.mxu2 %v1088_v45 }
 0x4c3   :  { %809 = vmatmul.f32.vlgmr.msra.gmra.mxu0 %v2922_v13  ;;  %v1058_v30 = vpop.permute.xlu0 %1057 }
 0x4c4   :  { %1150 = vmatpush.msra.mxu2 %v1087_v51  ;;  %v1073_v15 = vmul.f32 %v1058_v30, %v2480_v17  ;;  %v3242_v17 = vld [vmem:[#allocation3_spill] sm:$0xff] }
 0x4c5   :  { %1108 = vmatpush.xpose.msra.mxu1 %v1082_v28 }
 0x4c6   :  { %1151 = vmatpush.msra.mxu2 %v1086_v4  ;;  %v1081_v29 = vadd.f32 %v1073_v15, %v1049_v49 }
 0x4c8   :  { %1152 = vmatpush.msra.mxu2 %v1085_v23 }
 0x4c9   :  { %1109 = vmatpush.xpose.msra.mxu1 %v1081_v29 }
 0x4ca   :  { %1153 = vmatpush.msra.mxu2 %v1084_v3 }
 0x4cc   :  { %1154 = vmatpush.msra.mxu2 %v1083_v10  ;;  %1110 = vmatmul.f32.vlgmr.msra.gmra.mxu1 %v2494_v6  ;;  %v3243_v6 = vld [vmem:[#allocation2_spill] sm:$0xff] }
 0x4cd   :  { %1549 = vmatpush.msrb.mxu1 %v2565_v46 }
 0x4ce   :  { %1155 = vmatpush.msra.mxu2 %v1082_v28 }
 0x4cf   :  { %1550 = vmatpush.msrb.mxu1 %v2570_v53  ;;  %v3244_v53 = vld [vmem:[#allocation4_spill] sm:$0xff] }
 0x4d0   :  { %1156 = vmatpush.msra.mxu2 %v1081_v29 }
 0x4d1   :  { %1551 = vmatpush.msrb.mxu1 %v2578_v36 }
 0x4d3   :  { %1552 = vmatpush.msrb.mxu1 %v2590_v2  ;;  %v3245_v2 = vld [vmem:[#allocation5_spill] sm:$0xff] }
 0x4d5   :  { %1553 = vmatpush.msrb.mxu1 %v2600_v37 }
 0x4d7   :  { %1554 = vmatpush.msrb.mxu1 %v2611_v47 }
 0x4d9   :  { %1555 = vmatpush.msrb.mxu1 %v2620_v1 }
 0x4db   :  { %1556 = vmatpush.msrb.mxu1 %v2634_v33 }
 0x4dd   :  { %1557 = vmatpush.msrb.mxu1 %v2644_v50 }
 0x4df   :  { %1558 = vmatpush.msrb.mxu1 %v2655_v42 }
 0x4e1   :  { %1559 = vmatpush.msrb.mxu1 %v2663_v63 }
 0x4e3   :  { %1560 = vmatpush.msrb.mxu1 %v2677_v48 }
 0x4e5   :  { %1561 = vmatpush.msrb.mxu1 %v2687_v8  ;;  %v1276_v39 = vpop.xlane.xlu1 %1275  ;;  %v1274_v25 = vpop.xlane.xlu2 %1273 }
 0x4e6   :  { %v1284_v46 = vmul.f32 %v1276_v39, %v3243_v6  ;;  %v1283_v27 = vmul.f32 %v1274_v25, %v3243_v6 }
 0x4e7   :  { %1562 = vmatpush.msrb.mxu1 %v3242_v17 }
 0x4e8   :  { %v2946_v36 = vsub.f32 %v2837_v26, %v1284_v46  ;;  %v2969_v34 = vsub.f32 %v2870_v9, %v1283_v27 }
 0x4e9   :  { %1563 = vmatpush.msrb.mxu1 %v3244_v53 }
 0x4ea   :  { %v1300_v37 = vmul.f32 %v2946_v36, %v2946_v36 }
 0x4eb   :  { %1564 = vmatpush.msrb.mxu1 %v3245_v2 }
 0x4ec   :  { %1315 = vadd.xlane.f32.xlu2 %v1300_v37 }
 0x4ed   :  { %v1270_v47 = vpop.xlane.xlu1 %1269  ;;  %v1268_v60 = vpop.xlane.xlu2 %1267 }
 0x4ee   :  { %v1281_v1 = vmul.f32 %v1270_v47, %v3243_v6  ;;  %v1280_v35 = vmul.f32 %v1268_v60, %v3243_v6  ;;  %v3020_v47 = vld [vmem:[%s3206_s0 + $0xd0] sm:$0xff] }
 0x4f0   :  { %v2953_v33 = vsub.f32 %v2846_v44, %v1281_v1  ;;  %v2980_v62 = vsub.f32 %v2884_v18, %v1280_v35 }
 0x4f2   :  { %v1297_v50 = vmul.f32 %v2953_v33, %v2953_v33  ;;  %v1296_v19 = vmul.f32 %v2980_v62, %v2980_v62 }
 0x4f4   :  { %1309 = vadd.xlane.f32.xlu2 %v1297_v50 }
 0x4f5   :  { %v1264_v42 = vpop.xlane.xlu1 %1263  ;;  %v1262_v9 = vpop.xlane.xlu2 %1261 }
 0x4f6   :  { %v1278_v63 = vmul.f32 %v1264_v42, %v3243_v6  ;;  %v1277_v0 = vmul.f32 %v1262_v9, %v3243_v6 }
 0x4f8   :  { %v2959_v48 = vsub.f32 %v2852_v5, %v1278_v63  ;;  %v1299_v5 = vmul.f32 %v2969_v34, %v2969_v34  ;;  %v2992_v18 = vsub.f32 %v2914_v12, %v1277_v0 }
 0x4fa   :  { %v1294_v8 = vmul.f32 %v2959_v48, %v2959_v48  ;;  %v1293_v23 = vmul.f32 %v2992_v18, %v2992_v18 }
 0x4fc   :  { %1303 = vadd.xlane.f32.xlu2 %v1294_v8 }
 0x50f   :  { %v1272_v45 = vpop.xlane.xlu0 %1271 }
 0x510   :  { %v1282_v51 = vmul.f32 %v1272_v45, %v3243_v6 }
 0x512   :  { %v2983_v4 = vsub.f32 %v2875_v58, %v1282_v51 }
 0x514   :  { %v1298_v40 = vmul.f32 %v2983_v4, %v2983_v4 }
 0x517   :  { %v1266_v16 = vpop.xlane.xlu0 %1265 }
 0x518   :  { %v1279_v31 = vmul.f32 %v1266_v16, %v3243_v6 }
 0x51a   :  { %v2995_v58 = vsub.f32 %v2890_v21, %v1279_v31 }
 0x51c   :  { %v1295_v38 = vmul.f32 %v2995_v58, %v2995_v58 }
 0x540   :  { %v2964_v26 = vpop.f32.mrf.mxu0 }
 0x541   :  { %v813_v44 = vsel %vm424_vm1, %v2964_v26, -inf }
 0x542   :  { %814 = vmax.xlane.f32.xlu0 %v813_v44 }
 0x549   :  { %v2975_v43 = vpop.f32.mrf.mxu1 }
 0x54a   :  { %v1114_v22 = vsel %vm336_vm10, %v2975_v43, -inf  ;;  %1313 = vadd.xlane.f32.xlu0 %v1299_v5 }
 0x54b   :  { %1115 = vmax.xlane.f32.xlu1 %v1114_v22 }
 0x552   :  { %1307 = vadd.xlane.f32.xlu0 %v1296_v19 }
 0x553   :  { %1311 = vadd.xlane.f32.xlu1 %v1298_v40 }
 0x55a   :  { %1301 = vadd.xlane.f32.xlu0 %v1293_v23 }
 0x55b   :  { %1305 = vadd.xlane.f32.xlu1 %v1295_v38 }
 0x55f   :  { %v1316_v20 = vpop.xlane.xlu2 %1315 }
 0x560   :  { %v1324_v3 = vmul.f32 %v1316_v20, %v3243_v6 }
 0x562   :  { %v1332_v52 = vadd.f32 1e-05, %v1324_v3 }
 0x564   :  { %1750 = vrsqrt.f32 %v1332_v52  ;;  %vm1409_vm2 = vweird.f32 %v1332_v52 }
 0x567   :  { %v1310_v55 = vpop.xlane.xlu2 %1309 }
 0x568   :  { %v1321_v56 = vmul.f32 %v1310_v55, %v3243_v6 }
 0x56a   :  { %v1751_v32 = vpop.eup %1750  ;;  %v1329_v57 = vadd.f32 1e-05, %v1321_v56 }
 0x56b   :  { %v1404_v21 = vmul.f32 %v1751_v32, %v1332_v52  ;;  %vm1410_vm3 = vweird.f32 %v1751_v32 }
 0x56c   :  { %1752 = vrsqrt.f32 %v1329_v57  ;;  %vm1411_vm4 = vmor %vm1409_vm2, %vm1410_vm3  ;;  %vm1379_vm5 = vweird.f32 %v1329_v57 }
 0x56d   :  { %v1405_v59 = vmul.f32 %v1751_v32, %v1404_v21 }
 0x56f   :  { %v1406_v10 = vmul.f32 0.5, %v1405_v59 }
 0x571   :  { %v1407_v54 = vsub.f32 1.5, %v1406_v10 }
 0x572   :  { %v1753_v11 = vpop.eup %1752 }
 0x573   :  { %v1408_v12 = vmul.f32 %v1751_v32, %v1407_v54  ;;  %v1374_v61 = vmul.f32 %v1753_v11, %v1329_v57  ;;  %vm1380_vm6 = vweird.f32 %v1753_v11 }
 0x574   :  { %vm1381_vm7 = vmor %vm1379_vm5, %vm1380_vm6 }
 0x575   :  { %v1412_v28 = vsel %vm1411_vm4, %v1751_v32, %v1408_v12  ;;  %v1375_v30 = vmul.f32 %v1753_v11, %v1374_v61 }
 0x576   :  { %v1420_v49 = vmul.f32 %v1412_v28, %v2946_v36 }
 0x577   :  { %v1376_v15 = vmul.f32 0.5, %v1375_v30 }
 0x578   :  { %v1428_v29 = vmul.f32 %v2746_v24, %v1420_v49 }
 0x579   :  { %v1377_v39 = vsub.f32 1.5, %v1376_v15 }
 0x57a   :  { %v3006_v17 = vadd.f32 %v2756_v41, %v1428_v29 }
 0x57b   :  { %v1378_v46 = vmul.f32 %v1753_v11, %v1377_v39 }
 0x57c   :  { %1459 = vrot.lane.b32.xlu0 %v3006_v17, %s1808_s19 }
 0x57d   :  { %v1382_v53 = vsel %vm1381_vm7, %v1753_v11, %v1378_v46 }
 0x57e   :  { %v1417_v2 = vmul.f32 %v1382_v53, %v2953_v33  ;;  %v1304_v53 = vpop.xlane.xlu2 %1303 }
 0x580   :  { %v1425_v37 = vmul.f32 %v2746_v24, %v1417_v2 }
 0x582   :  { %v3013_v36 = vadd.f32 %v2756_v41, %v1425_v37 }
 0x584   :  { %1453 = vrot.lane.b32.xlu0 %v3013_v36, %s1808_s19 }
 0x58c   :  { %1090 = vrot.lane.b32.xlu0 %v3020_v47, %s1808_s19 }
 0x5b5   :  { %v3024_v1 = vpop.xlane.xlu0 %814 }
 0x5b6   :  { %v816_v2 = vsub.f32 %v2964_v26, %v3024_v1 }
 0x5bd   :  { %v1314_v50 = vpop.xlane.xlu0 %1313 }
 0x5be   :  { %v3026_v33 = vpop.xlane.xlu1 %1115  ;;  %v1323_v42 = vmul.f32 %v1314_v50, %v3243_v6  ;;  %v817_v50 = vmul.f32 1.442695, %v816_v2 }
 0x5c0   :  { %v1331_v63 = vadd.f32 1e-05, %v1323_v42 }
 0x5c2   :  { %1754 = vrsqrt.f32 %v1331_v63  ;;  %vm1399_vm11 = vweird.f32 %v1331_v63 }
 0x5c5   :  { %v1308_v8 = vpop.xlane.xlu0 %1307 }
 0x5c6   :  { %v1312_v25 = vpop.xlane.xlu1 %1311 }
 0x5c7   :  { %v1322_v27 = vmul.f32 %v1312_v25, %v3243_v6 }
 0x5c8   :  { %v1755_v44 = vpop.eup %1754 }
 0x5c9   :  { %v1394_v60 = vmul.f32 %v1755_v44, %v1331_v63  ;;  %v1330_v45 = vadd.f32 1e-05, %v1322_v27  ;;  %vm1400_vm8 = vweird.f32 %v1755_v44 }
 0x5ca   :  { %vm1401_vm12 = vmor %vm1399_vm11, %vm1400_vm8 }
 0x5cb   :  { %v1395_v5 = vmul.f32 %v1755_v44, %v1394_v60  ;;  %1756 = vrsqrt.f32 %v1330_v45  ;;  %vm1389_vm14 = vweird.f32 %v1330_v45 }
 0x5cd   :  { %v1396_v35 = vmul.f32 0.5, %v1395_v5  ;;  %v1302_v51 = vpop.xlane.xlu0 %1301  ;;  %v1089_v5 = vmul.f32 %v2899_v7, %v3020_v47 }
 0x5ce   :  { %v1317_v22 = vmul.f32 %v1302_v51, %v3243_v6  ;;  %v1306_v46 = vpop.xlane.xlu1 %1305 }
 0x5cf   :  { %v1397_v9 = vsub.f32 1.5, %v1396_v35  ;;  %v1319_v37 = vmul.f32 %v1306_v46, %v3243_v6 }
 0x5d0   :  { %v1325_v16 = vadd.f32 1e-05, %v1317_v22 }
 0x5d1   :  { %v1757_v19 = vpop.eup %1756  ;;  %v1398_v0 = vmul.f32 %v1755_v44, %v1397_v9  ;;  %v1327_v42 = vadd.f32 1e-05, %v1319_v37 }
 0x5d2   :  { %v1384_v40 = vmul.f32 %v1757_v19, %v1330_v45  ;;  %1758 = vrsqrt.f32 %v1325_v16  ;;  %vm1390_vm13 = vweird.f32 %v1757_v19  ;;  %vm1339_vm0 = vweird.f32 %v1325_v16 }
 0x5d3   :  { %v1402_v31 = vsel %vm1401_vm12, %v1755_v44, %v1398_v0  ;;  %vm1391_vm15 = vmor %vm1389_vm14, %vm1390_vm13  ;;  %v1792_v44 = vld [vmem:[%s3213_s2 + $0x20] sm:$0xff]  ;;  %vm1359_vm7 = vweird.f32 %v1327_v42 }
 0x5d4   :  { %v1385_v23 = vmul.f32 %v1757_v19, %v1384_v40  ;;  %v1419_v38 = vmul.f32 %v1402_v31, %v2969_v34 }
 0x5d6   :  { %v1386_v20 = vmul.f32 0.5, %v1385_v23  ;;  %v1427_v3 = vmul.f32 %v2746_v24, %v1419_v38 }
 0x5d8   :  { %v1759_v52 = vpop.eup %1758  ;;  %v1387_v55 = vsub.f32 1.5, %v1386_v20  ;;  %v3034_v56 = vadd.f32 %v2756_v41, %v1427_v3 }
 0x5d9   :  { %v1334_v32 = vmul.f32 %v1759_v52, %v1325_v16  ;;  %vm1340_vm2 = vweird.f32 %v1759_v52 }
 0x5da   :  { %v1388_v57 = vmul.f32 %v1757_v19, %v1387_v55  ;;  %1457 = vrot.lane.b32.xlu1 %v3034_v56, %s1808_s19  ;;  %vm1341_vm3 = vmor %vm1339_vm0, %vm1340_vm2 }
 0x5db   :  { %v1335_v21 = vmul.f32 %v1759_v52, %v1334_v32 }
 0x5dc   :  { %v1392_v59 = vsel %vm1391_vm15, %v1757_v19, %v1388_v57 }
 0x5dd   :  { %v1336_v10 = vmul.f32 0.5, %v1335_v21  ;;  %v1418_v34 = vmul.f32 %v1392_v59, %v2983_v4  ;;  %v1320_v4 = vmul.f32 %v1308_v8, %v3243_v6  ;;  %v1791_v8 = vld [vmem:[%s3212_s1 + $0x20] sm:$0xff] }
 0x5de   :  { %v1441_v27 = vmul.f32 %v1791_v8, %v3013_v36  ;;  %v1793_v36 = vld [vmem:[%s3213_s2 + $0x38] sm:$0xff]  ;;  %v1798_v8 = vld [vmem:[%s3212_s1 + $0x28] sm:$0xff] }
 0x5df   :  { %v1337_v54 = vsub.f32 1.5, %v1336_v10  ;;  %v1426_v11 = vmul.f32 %v2746_v24, %v1418_v34  ;;  %v1328_v39 = vadd.f32 1e-05, %v1320_v4 }
 0x5e1   :  { %v1338_v12 = vmul.f32 %v1759_v52, %v1337_v54  ;;  %v3041_v61 = vadd.f32 %v2756_v41, %v1426_v11  ;;  %1760 = vrsqrt.f32 %v1328_v39  ;;  %vm1369_vm4 = vweird.f32 %v1328_v39 }
 0x5e2   :  { %1762 = vpow2.f32 %v817_v50  ;;  %v1795_v50 = vld [vmem:[%s3213_s2 + $0x28] sm:$0xff] }
 0x5e3   :  { %v1342_v28 = vsel %vm1341_vm3, %v1759_v52, %v1338_v12  ;;  %1455 = vrot.lane.b32.xlu2 %v3041_v61, %s1808_s19  ;;  %1764 = vrsqrt.f32 %v1327_v42 }
 0x5e4   :  { %v1413_v30 = vmul.f32 %v1342_v28, %v2992_v18  ;;  %v1318_v18 = vmul.f32 %v1304_v53, %v3243_v6  ;;  %v1117_v6 = vsub.f32 %v2975_v43, %v3026_v33  ;;  %v1794_v43 = vld [vmem:[%s3212_s1 + $0x38] sm:$0xff] }
 0x5e5   :  { %v1444_v33 = vmul.f32 %v1794_v43, %v3006_v17 }
 0x5e6   :  { %v1421_v49 = vmul.f32 %v2746_v24, %v1413_v30  ;;  %v1326_v25 = vadd.f32 1e-05, %v1318_v18  ;;  %v1118_v35 = vmul.f32 1.442695, %v1117_v6 }
 0x5e7   :  { %v1761_v1 = vpop.eup %1760 }
 0x5e8   :  { %v3048_v15 = vadd.f32 %v2756_v41, %v1421_v49  ;;  %1766 = vrsqrt.f32 %v1326_v25  ;;  %v1364_v45 = vmul.f32 %v1761_v1, %v1328_v39  ;;  %v3073_v9 = vpop.eup %1762  ;;  %vm1370_vm5 = vweird.f32 %v1761_v1 }
 0x5e9   :  { %v1765_v19 = vpop.eup %1764  ;;  %1768 = vpow2.f32 %v1118_v35  ;;  %v819_v38 = vsel %vm424_vm1, %v3073_v9, 0.0  ;;  %vm1371_vm6 = vmor %vm1369_vm4, %vm1370_vm5  ;;  %vm1349_vm11 = vweird.f32 %v1326_v25 }
 0x5ea   :  { %1445 = vrot.lane.b32.xlu0 %v3048_v15, %s1808_s19  ;;  %v1365_v0 = vmul.f32 %v1761_v1, %v1364_v45  ;;  %v1354_v23 = vmul.f32 %v1765_v19, %v1327_v42  ;;  %vm1360_vm8 = vweird.f32 %v1765_v19 }
 0x5eb   :  { %vm1361_vm13 = vmor %vm1359_vm7, %vm1360_vm8 }
 0x5ec   :  { %v1366_v3 = vmul.f32 0.5, %v1365_v0  ;;  %v1355_v52 = vmul.f32 %v1765_v19, %v1354_v23 }
 0x5ee   :  { %v1460_v29 = vpop.permute.xlu0 %1459  ;;  %v1767_v47 = vpop.eup %1766  ;;  %v1367_v32 = vsub.f32 1.5, %v1366_v3  ;;  %v1356_v57 = vmul.f32 0.5, %v1355_v52 }
 0x5ef   :  { %v1468_v51 = vmul.f32 %v1793_v36, %v1460_v29  ;;  %v1344_v20 = vmul.f32 %v1767_v47, %v1326_v25  ;;  %v3088_v55 = vpop.eup %1768  ;;  %vm1350_vm12 = vweird.f32 %v1767_v47 }
 0x5f0   :  { %v1120_v21 = vsel %vm336_vm10, %v3088_v55, 0.0  ;;  %v1368_v10 = vmul.f32 %v1761_v1, %v1367_v32  ;;  %v1357_v34 = vsub.f32 1.5, %v1356_v57  ;;  %vm1351_vm14 = vmor %vm1349_vm11, %vm1350_vm12 }
 0x5f1   :  { %v3082_v31 = vadd.f32 %v1468_v51, %v1444_v33  ;;  %v1345_v17 = vmul.f32 %v1767_v47, %v1344_v20 }
 0x5f2   :  { %v1372_v11 = vsel %vm1371_vm6, %v1761_v1, %v1368_v10  ;;  %v1358_v12 = vmul.f32 %v1765_v19, %v1357_v34  ;;  %v1800_v10 = vld [vmem:[%s3212_s1 + $0x18] sm:$0xff] }
 0x5f3   :  { %v1346_v59 = vmul.f32 0.5, %v1345_v17  ;;  %v1416_v28 = vmul.f32 %v1372_v11, %v2980_v62  ;;  %v1801_v34 = vld [vmem:[%s3213_s2 + $0x18] sm:$0xff] }
 0x5f4   :  { %v1362_v49 = vsel %vm1361_vm13, %v1765_v19, %v1358_v12  ;;  %v1802_v12 = vld [vmem:[%s3212_s1 + $0x10] sm:$0xff] }
 0x5f5   :  { %v1347_v54 = vsub.f32 1.5, %v1346_v59  ;;  %v1424_v4 = vmul.f32 %v2746_v24, %v1416_v28  ;;  %v1415_v39 = vmul.f32 %v1362_v49, %v2995_v58  ;;  %v1679_v49 = vld [vmem:[%s3206_s0 + $0x118] sm:$0xff] }
 0x5f6   :  { %v1454_v63 = vpop.permute.xlu0 %1453 }
 0x5f7   :  { %v1465_v26 = vmul.f32 %v1792_v44, %v1454_v63  ;;  %v1348_v30 = vmul.f32 %v1767_v47, %v1347_v54  ;;  %v3096_v46 = vadd.f32 %v2756_v41, %v1424_v4  ;;  %v1423_v2 = vmul.f32 %v2746_v24, %v1415_v39  ;;  %v1797_v63 = vld [vmem:[%s3213_s2 + $0x30] sm:$0xff]  ;;  %v1803_v39 = vld [vmem:[%s3213_s2] sm:$0xff] }
 0x5f9   :  { %v3064_v60 = vadd.f32 %v1465_v26, %v1441_v27  ;;  %v1352_v29 = vsel %vm1351_vm14, %v1767_v47, %v1348_v30  ;;  %v3104_v37 = vadd.f32 %v2756_v41, %v1423_v2  ;;  %v1442_v27 = vmul.f32 %v1798_v8, %v3041_v61 }
 0x5fa   :  { %v1414_v53 = vmul.f32 %v1352_v29, %v2959_v48 }
 0x5fb   :  { %v1439_v28 = vmul.f32 %v1802_v12, %v3104_v37 }
 0x5fc   :  { %v1422_v62 = vmul.f32 %v2746_v24, %v1414_v53  ;;  %v1796_v24 = vld [vmem:[%s3212_s1 + $0x30] sm:$0xff]  ;;  %v1804_v53 = vld [vmem:[%s3212_s1 + $0x8] sm:$0xff] }
 0x5fe   :  { %v1091_v22 = vpop.permute.xlu0 %1090  ;;  %v3107_v18 = vadd.f32 %v2756_v41, %v1422_v62  ;;  %v1443_v41 = vmul.f32 %v1796_v24, %v3034_v56 }
 0x5ff   :  { %v1092_v16 = vmul.f32 %v2907_v14, %v1091_v22 }
 0x600   :  { %v1438_v2 = vmul.f32 %v1804_v53, %v3107_v18 }
 0x601   :  { %v3080_v40 = vadd.f32 %v1092_v16, %v1089_v5 }
 0x603   :  { %1243 = vmatpush.msrb.mxu0 %v3080_v40 }
 0x604   :  { %820 = vadd.xlane.f32.xlu1 %v819_v38 }
 0x605   :  { %1537 = vmatpush.msra.mxu0 %v3082_v31 }
 0x60c   :  { %1121 = vadd.xlane.f32.xlu2 %v1120_v21 }
 0x61d   :  { %1451 = vrot.lane.b32.xlu1 %v3096_v46, %s1808_s19 }
 0x624   :  { %1449 = vrot.lane.b32.xlu2 %v3104_v37, %s1808_s19  ;;  %v1806_v37 = vld [vmem:[%s3212_s1] sm:$0xff] }
 0x625   :  { %1447 = vrot.lane.b32.xlu1 %v3107_v18, %s1808_s19  ;;  %v1807_v18 = vld [vmem:[%s3214_s5] sm:$0xff] }
 0x62c   :  { %1478 = vrot.lane.b32.xlu2 %v1679_v49, %s1808_s19 }
 0x63d   :  { %v1456_v48 = vpop.permute.xlu2 %1455 }
 0x63e   :  { %v1466_v42 = vmul.f32 %v1795_v50, %v1456_v48  ;;  %v1437_v48 = vmul.f32 %v1806_v37, %v3048_v15  ;;  %v1477_v15 = vmul.f32 %v2899_v7, %v1679_v49 }
 0x640   :  { %v3129_v26 = vadd.f32 %v1466_v42, %v1442_v27 }
 0x64c   :  { %v1458_v58 = vpop.permute.xlu1 %1457 }
 0x64d   :  { %v1467_v25 = vmul.f32 %v1797_v63, %v1458_v58 }
 0x64f   :  { %v3127_v44 = vadd.f32 %v1467_v25, %v1443_v41 }
 0x651   :  { %1538 = vmatpush.msra.mxu0 %v3127_v44 }
 0x653   :  { %1539 = vmatpush.msra.mxu0 %v3129_v26 }
 0x655   :  { %1540 = vmatpush.msra.mxu0 %v3064_v60 }
 0x65c   :  { %v1446_v29 = vpop.permute.xlu0 %1445 }
 0x677   :  { %v821_v56 = vpop.xlane.xlu1 %820 }
 0x678   :  { %1770 = vrcp.f32 %v821_v56  ;;  %v833_v35 = vand.u32 2147483648, %v821_v56  ;;  %v831_v61 = vand.u32 2147483647, %v821_v56  ;;  %vm827_vm0 = vweird.f32 %v821_v56 }
 0x67a   :  { %v834_v16 = vor.u32 1.1754944e-38, %v833_v35  ;;  %vm832_vm3 = vcmp.eq.f32.partialorder %v831_v61, 8.507059e+37 }
 0x67e   :  { %v1771_v1 = vpop.eup %1770 }
 0x67f   :  { %v823_v6 = vmul.f32 %v1771_v1, %v821_v56  ;;  %v1122_v45 = vpop.xlane.xlu2 %1121  ;;  %vm828_vm15 = vweird.f32 %v1771_v1 }
 0x680   :  { %1772 = vrcp.f32 %v1122_v45  ;;  %vm829_vm2 = vmor %vm827_vm0, %vm828_vm15  ;;  %v1134_v23 = vand.u32 2147483648, %v1122_v45  ;;  %v1132_v20 = vand.u32 2147483647, %v1122_v45  ;;  %vm1128_vm5 = vweird.f32 %v1122_v45 }
 0x681   :  { %v824_v5 = vsub.f32 1.0, %v823_v6 }
 0x682   :  { %v1135_v17 = vor.u32 1.1754944e-38, %v1134_v23  ;;  %vm1133_vm7 = vcmp.eq.f32.partialorder %v1132_v20, 8.507059e+37 }
 0x683   :  { %v825_v36 = vmul.f32 %v1771_v1, %v824_v5 }
 0x685   :  { %v826_v51 = vadd.f32 %v1771_v1, %v825_v36 }
 0x686   :  { %v1773_v22 = vpop.eup %1772 }
 0x687   :  { %v1124_v19 = vmul.f32 %v1773_v22, %v1122_v45  ;;  %v830_v0 = vsel %vm829_vm2, %v1771_v1, %v826_v51  ;;  %vm1129_vm4 = vweird.f32 %v1773_v22  ;;  %v1450_v52 = vpop.permute.xlu2 %1449 }
 0x688   :  { %v835_v43 = vsel %vm832_vm3, %v834_v16, %v830_v0  ;;  %vm1130_vm6 = vmor %vm1128_vm5, %vm1129_vm4 }
 0x689   :  { %v1125_v33 = vsub.f32 1.0, %v1124_v19  ;;  %v836_v47 = vmul.f32 %v3073_v9, %v835_v43  ;;  %v1799_v9 = vld [vmem:[%s3213_s2 + $0x10] sm:$0xff] }
 0x68a   :  { %v1463_v59 = vmul.f32 %v1799_v9, %v1450_v52 }
 0x68b   :  { %v1126_v38 = vmul.f32 %v1773_v22, %v1125_v33  ;;  %1655 = vmatmul.msk.f32.vlgmr.msrb.gmra.mxu2 %vm449_vm9, %v836_v47 }
 0x68c   :  { %1196 = vmatpush.xpose.msrb.mxu2 %v3080_v40  ;;  %v1440_v40 = vmul.f32 %v1800_v10, %v3096_v46  ;;  %v1471_v4 = vadd.f32 %v1463_v59, %v1439_v28  ;;  %v1461_v46 = vmul.f32 %v1803_v39, %v1446_v29 }
 0x68d   :  { %v1127_v3 = vadd.f32 %v1773_v22, %v1126_v38 }
 0x68e   :  { %v1469_v50 = vadd.f32 %v1461_v46, %v1437_v48 }
 0x68f   :  { %v1131_v32 = vsel %vm1130_vm6, %v1773_v22, %v1127_v3  ;;  %v1452_v57 = vpop.permute.xlu1 %1451  ;;  %v1479_v42 = vpop.permute.xlu2 %1478 }
 0x690   :  { %v1136_v21 = vsel %vm1133_vm7, %v1135_v17, %v1131_v32  ;;  %v1464_v54 = vmul.f32 %v1801_v34, %v1452_v57  ;;  %v1480_v24 = vmul.f32 %v2907_v14, %v1479_v42 }
 0x691   :  { %v1137_v11 = vmul.f32 %v3088_v55, %v1136_v21 }
 0x692   :  { %v1472_v30 = vadd.f32 %v1464_v54, %v1440_v40  ;;  %v1481_v41 = vadd.f32 %v1480_v24, %v1477_v15 }
 0x693   :  { %1667 = vmatmul.msk.f32.vlgmr.msra.gmra.mxu2 %vm336_vm10, %v1137_v11 }
 0x694   :  { %1490 = vmatpush.xpose.msra.mxu2 %v3082_v31  ;;  %1541 = vmatpush.msra.mxu0 %v1472_v30  ;;  %v1805_v31 = vld [vmem:[%s3213_s2 + $0x8] sm:$0xff] }
 0x695   :  { %1584 = vmatpush.xpose.msra.mxu3 %v1481_v41 }
 0x696   :  { %1542 = vmatpush.msra.mxu0 %v1471_v4 }
 0x697   :  { %v1448_v55 = vpop.permute.xlu1 %1447 }
 0x698   :  { %v1462_v62 = vmul.f32 %v1805_v31, %v1448_v55  ;;  %1491 = vmatpush.xpose.msra.mxu2 %v3127_v44 }
 0x69a   :  { %v1470_v58 = vadd.f32 %v1462_v62, %v1438_v2 }
 0x69b   :  { %1197 = vmatmul.f32.vlgmr.msrb.gmra.mxu2 %v2922_v13 }
 0x69c   :  { %1492 = vmatpush.xpose.msra.mxu2 %v3129_v26  ;;  %1543 = vmatpush.msra.mxu0 %v1470_v58 }
 0x69e   :  { %1544 = vmatpush.msra.mxu0 %v1469_v50 }
 0x6a0   :  { %1493 = vmatpush.xpose.msra.mxu2 %v3064_v60 }
 0x6a4   :  { %1494 = vmatpush.xpose.msra.mxu2 %v1472_v30 }
 0x6a8   :  { %1495 = vmatpush.xpose.msra.mxu2 %v1471_v4 }
 0x6ac   :  { %1496 = vmatpush.xpose.msra.mxu2 %v1470_v58 }
 0x6b0   :  { %1497 = vmatpush.xpose.msra.mxu2 %v1469_v50 }
 0x6b3   :  { %1498 = vmatmul.f32.vlgmr.msra.gmra.mxu2 %v1807_v18 }
 0x70e   :  { %v857_v63 = vpop.f32.mrf.mxu2 }
 0x70f   :  { %1657 = vst [vmem:[%s3215_s10 + $0x18] sm:$0x1] %v857_v63 }
 0x716   :  { %v1158_v60 = vpop.f32.mrf.mxu2 }
 0x717   :  { %1177 = vmatmul.f32.vlgmr.msrb.gmra.mxu3 %v1158_v60 }
 0x718   :  { %1631 = vmatpush.msrb.mxu3 %v1481_v41 }
 0x71e   :  { %v1198_v25 = vpop.f32.mrf.mxu2 }
 0x71f   :  { %v1201_v8 = vsel %vm424_vm1, %v1198_v25, -inf  ;;  %1585 = vmatmul.f32.vlgmr.msra.gmra.mxu3 %v2922_v13 }
 0x720   :  { %1202 = vmax.xlane.f32.xlu1 %v1201_v8 }
 0x736   :  { %v1499_v7 = vpop.f32.mrf.mxu2 }
 0x737   :  { %v1502_v27 = vsel %vm336_vm10, %v1499_v7, -inf }
 0x738   :  { %1503 = vmax.xlane.f32.xlu0 %v1502_v27 }
 0x793   :  { %v1203_v14 = vpop.xlane.xlu1 %1202 }
 0x794   :  { %v1204_v44 = vsub.f32 %v1198_v25, %v1203_v14 }
 0x796   :  { %v1205_v26 = vmul.f32 1.442695, %v1204_v44 }
 0x798   :  { %1774 = vpow2.f32 %v1205_v26 }
 0x79a   :  { %v1178_v56 = vpop.f32.mrf.mxu3 }
 0x79b   :  { %1669 = vst [vmem:[%s3215_s10 + $0x20] sm:$0xff] %v1178_v56 }
 0x79e   :  { %v1775_v1 = vpop.eup %1774 }
 0x79f   :  { %v1207_v6 = vsel %vm424_vm1, %v1775_v1, 0.0 }
 0x7a0   :  { %1208 = vadd.xlane.f32.xlu2 %v1207_v6 }
 0x7a2   :  { %v1586_v45 = vpop.f32.mrf.mxu3 }
 0x7a3   :  { %v1589_v13 = vsel %vm424_vm1, %v1586_v45, -inf }
 0x7a8   :  { %1590 = vmax.xlane.f32.xlu2 %v1589_v13 }
 0x7ab   :  { %v1504_v5 = vpop.xlane.xlu0 %1503 }
 0x7ac   :  { %v1505_v35 = vsub.f32 %v1499_v7, %v1504_v5 }
 0x7ae   :  { %v1506_v36 = vmul.f32 1.442695, %v1505_v35 }
 0x7b0   :  { %1776 = vpow2.f32 %v1506_v36 }
 0x7b6   :  { %v1777_v61 = vpop.eup %1776 }
 0x7b7   :  { %v1508_v51 = vsel %vm336_vm10, %v1777_v61, 0.0 }
 0x7b8   :  { %1509 = vadd.xlane.f32.xlu1 %v1508_v51 }
 0x813   :  { %v1209_v22 = vpop.xlane.xlu2 %1208 }
 0x814   :  { %1778 = vrcp.f32 %v1209_v22  ;;  %v1221_v47 = vand.u32 2147483648, %v1209_v22  ;;  %v1219_v20 = vand.u32 2147483647, %v1209_v22  ;;  %vm1215_vm11 = vweird.f32 %v1209_v22 }
 0x816   :  { %v1222_v52 = vor.u32 1.1754944e-38, %v1221_v47  ;;  %vm1220_vm13 = vcmp.eq.f32.partialorder %v1219_v20, 8.507059e+37 }
 0x81a   :  { %v1779_v16 = vpop.eup %1778 }
 0x81b   :  { %v1211_v19 = vmul.f32 %v1779_v16, %v1209_v22  ;;  %v1591_v0 = vpop.xlane.xlu2 %1590  ;;  %vm1216_vm8 = vweird.f32 %v1779_v16 }
 0x81c   :  { %v1592_v43 = vsub.f32 %v1586_v45, %v1591_v0  ;;  %vm1217_vm12 = vmor %vm1215_vm11, %vm1216_vm8 }
 0x81d   :  { %v1212_v33 = vsub.f32 1.0, %v1211_v19 }
 0x81e   :  { %v1593_v23 = vmul.f32 1.442695, %v1592_v43 }
 0x81f   :  { %v1213_v38 = vmul.f32 %v1779_v16, %v1212_v33 }
 0x820   :  { %1780 = vpow2.f32 %v1593_v23 }
 0x821   :  { %v1214_v3 = vadd.f32 %v1779_v16, %v1213_v38 }
 0x823   :  { %v1218_v17 = vsel %vm1217_vm12, %v1779_v16, %v1214_v3 }
 0x824   :  { %v1223_v32 = vsel %vm1220_vm13, %v1222_v52, %v1218_v17 }
 0x825   :  { %v1224_v57 = vmul.f32 %v1775_v1, %v1223_v32 }
 0x826   :  { %v1781_v21 = vpop.eup %1780 }
 0x827   :  { %1668 = vmatmul.msk.f32.vlgmr.msrb.gmra.mxu0 %vm449_vm9, %v1224_v57  ;;  %v1595_v9 = vsel %vm424_vm1, %v1781_v21, 0.0 }
 0x828   :  { %1596 = vadd.xlane.f32.xlu0 %v1595_v9 }
 0x82b   :  { %v1510_v59 = vpop.xlane.xlu1 %1509 }
 0x82c   :  { %1782 = vrcp.f32 %v1510_v59  ;;  %v1522_v54 = vand.u32 2147483648, %v1510_v59  ;;  %v1520_v12 = vand.u32 2147483647, %v1510_v59  ;;  %vm1516_vm15 = vweird.f32 %v1510_v59 }
 0x82e   :  { %v1523_v30 = vor.u32 1.1754944e-38, %v1522_v54  ;;  %vm1521_vm2 = vcmp.eq.f32.partialorder %v1520_v12, 8.507059e+37 }
 0x832   :  { %v1783_v10 = vpop.eup %1782 }
 0x833   :  { %v1512_v40 = vmul.f32 %v1783_v10, %v1510_v59  ;;  %vm1517_vm14 = vweird.f32 %v1783_v10 }
 0x834   :  { %vm1518_vm0 = vmor %vm1516_vm15, %vm1517_vm14 }
 0x835   :  { %v1513_v34 = vsub.f32 1.0, %v1512_v40 }
 0x837   :  { %v1514_v11 = vmul.f32 %v1783_v10, %v1513_v34 }
 0x839   :  { %v1515_v28 = vadd.f32 %v1783_v10, %v1514_v11 }
 0x83b   :  { %v1519_v49 = vsel %vm1518_vm0, %v1783_v10, %v1515_v28 }
 0x83c   :  { %v1524_v4 = vsel %vm1521_vm2, %v1523_v30, %v1519_v49 }
 0x83d   :  { %v1525_v29 = vmul.f32 %v1777_v61, %v1524_v4 }
 0x83f   :  { %1680 = vmatmul.msk.f32.vlgmr.msra.gmra.mxu0 %vm336_vm10, %v1525_v29 }
 0x89b   :  { %v1597_v55 = vpop.xlane.xlu0 %1596 }
 0x89c   :  { %1784 = vrcp.f32 %v1597_v55  ;;  %v1609_v31 = vand.u32 2147483648, %v1597_v55  ;;  %v1607_v37 = vand.u32 2147483647, %v1597_v55  ;;  %vm1603_vm3 = vweird.f32 %v1597_v55 }
 0x89e   :  { %v1610_v58 = vor.u32 1.1754944e-38, %v1609_v31  ;;  %vm1608_vm10 = vcmp.eq.f32.partialorder %v1607_v37, 8.507059e+37 }
 0x8a2   :  { %v1785_v39 = vpop.eup %1784 }
 0x8a3   :  { %v1599_v46 = vmul.f32 %v1785_v39, %v1597_v55  ;;  %vm1604_vm1 = vweird.f32 %v1785_v39 }
 0x8a4   :  { %v1245_v53 = vpop.f32.mrf.mxu0  ;;  %vm1605_vm4 = vmor %vm1603_vm3, %vm1604_vm1 }
 0x8a5   :  { %v1600_v2 = vsub.f32 1.0, %v1599_v46  ;;  %1670 = vst [vmem:[%s3215_s10 + $0x28] sm:$0x1] %v1245_v53 }
 0x8a7   :  { %v1601_v62 = vmul.f32 %v1785_v39, %v1600_v2 }
 0x8a9   :  { %v1602_v48 = vadd.f32 %v1785_v39, %v1601_v62 }
 0x8ab   :  { %v1606_v50 = vsel %vm1605_vm4, %v1785_v39, %v1602_v48 }
 0x8ac   :  { %v1611_v18 = vsel %vm1608_vm10, %v1610_v58, %v1606_v50 }
 0x8ad   :  { %v1612_v15 = vmul.f32 %v1781_v21, %v1611_v18 }
 0x8af   :  { %1681 = vmatmul.msk.f32.vlgmr.msrb.gmra.mxu3 %vm449_vm9, %v1612_v15 }
 0x8bc   :  { %v1546_v42 = vpop.f32.mrf.mxu0 }
 0x8bd   :  { %1565 = vmatmul.f32.vlgmr.msrb.gmra.mxu1 %v1546_v42 }
 0x932   :  { %v1633_v24 = vpop.f32.mrf.mxu3 }
 0x933   :  { %1683 = vst [vmem:[%s3215_s10 + $0x38] sm:$0x1] %v1633_v24 }
 0x93a   :  { %v1566_v41 = vpop.f32.mrf.mxu1 }
 0x93b   :  { %1682 = vst [vmem:[%s3215_s10 + $0x30] sm:$0xff] %v1566_v41 }

</bundles_post_ra>
